<compile_context>
chip_gen: v7x
topology: tpu7x:2x2x1
jax: 0.10.0
libtpu: 0.0.40
codegen_flags: <defaults>
</compile_context>

<pallas_src>
import functools

import jax
import jax.numpy as jnp
from jax.experimental import pallas as pl
from jax.experimental.pallas import tpu as pltpu


# ----------------------------- in-kernel helpers -----------------------------

def _layer_norm(x, gamma, beta, eps):
    mu = jnp.mean(x, axis=-1, keepdims=True)
    var = jnp.mean(jnp.square(x - mu), axis=-1, keepdims=True)
    return (x - mu) * jax.lax.rsqrt(var + eps) * gamma + beta


def _attention(q, k, v, mask, wo_ref, bo_ref, o_scratch, n_heads):
    """q: (Tq, D) f32, k/v: (Tk, D) f32, mask: (Tq, Tk). Returns (Tq, D) f32."""
    Tq, D = q.shape
    hd = D // n_heads
    scale = 1.0 / float(hd) ** 0.5

    qb = (q * scale).astype(jnp.bfloat16)   # fold 1/sqrt(hd) into q (cheap, O(Tq*D))
    kb = k.astype(jnp.bfloat16)
    vb = v.astype(jnp.bfloat16)

    for h in range(n_heads):                # static unroll; MXU work is per-head anyway
        lo = h * hd
        qh = qb[:, lo:lo + hd]
        kh = kb[:, lo:lo + hd]
        vh = vb[:, lo:lo + hd]
        # scores without materializing kh.T: contract last dims of both operands.
        s = jax.lax.dot_general(qh, kh, (((1,), (1,)), ((), ())),
                                preferred_element_type=jnp.float32)      # (Tq, Tk)
        s = jnp.where(mask > 0.0, s, jnp.float32(-1e9))
        s = s - jnp.max(s, axis=-1, keepdims=True)
        e = jnp.exp(s)
        p = e * pl.reciprocal(jnp.sum(e, axis=-1, keepdims=True), approx=True)
        # write head output directly into its slice of the (Tq, D) scratch (no concat)
        o_scratch[:, lo:lo + hd] = jnp.dot(p.astype(jnp.bfloat16), vh,
                                           preferred_element_type=jnp.float32)

    o = o_scratch[...].astype(jnp.bfloat16)
    return jnp.dot(o, wo_ref[...], preferred_element_type=jnp.float32) + bo_ref[...]


# --------------------------------- kernel ------------------------------------

def decoder_block_kernel(
    x_ref, enc_ref, omask_ref, imask_ref,
    # self-attention (fused QKV)
    sa_wqkv, sa_bqkv, sa_wo, sa_bo,
    # cross-attention (separate Q, fused KV)
    ca_wq, ca_bq, ca_wkv, ca_bkv, ca_wo, ca_bo,
    # ffn
    w1, b1, w2, b2,
    # layer norms
    g1, bt1, g2, bt2, g3, bt3,
    out_ref,
    o_scratch,
    *, n_heads, eps,
):
    D = x_ref.shape[-1]
    x = x_ref[0].astype(jnp.float32)            # (T, D) residual stream kept in f32
    enc = enc_ref[0].astype(jnp.bfloat16)       # (S, D) bf16 matmul operand
    omask = omask_ref[0]                        # (T, T)
    imask = imask_ref[0]                        # (T, S)

    # ---- self-attention (single fused QKV matmul) + residual + LN1 ----
    qkv = jnp.dot(x.astype(jnp.bfloat16), sa_wqkv[...],
                  preferred_element_type=jnp.float32) + sa_bqkv[...]     # (T, 3D)
    sa = _attention(qkv[:, :D], qkv[:, D:2 * D], qkv[:, 2 * D:],
                    omask, sa_wo, sa_bo, o_scratch, n_heads)
    x = _layer_norm(x + sa, g1[...], bt1[...], eps)

    # ---- cross-attention (Q from x, fused KV from encoder) + residual + LN2 ----
    q = jnp.dot(x.astype(jnp.bfloat16), ca_wq[...],
                preferred_element_type=jnp.float32) + ca_bq[...]         # (T, D)
    kv = jnp.dot(enc, ca_wkv[...],
                 preferred_element_type=jnp.float32) + ca_bkv[...]       # (S, 2D)
    ca = _attention(q, kv[:, :D], kv[:, D:], imask, ca_wo, ca_bo, o_scratch, n_heads)
    x = _layer_norm(x + ca, g2[...], bt2[...], eps)

    # ---- FFN + residual + LN3 ----
    h = jnp.maximum(jnp.dot(x.astype(jnp.bfloat16), w1[...],
                            preferred_element_type=jnp.float32) + b1[...], 0.0)
    f = jnp.dot(h.astype(jnp.bfloat16), w2[...],
                preferred_element_type=jnp.float32) + b2[...]
    x = _layer_norm(x + f, g3[...], bt3[...], eps)

    out_ref[0] = x.astype(out_ref.dtype)


# --------------------------------- wrapper -----------------------------------

PARAM_ORDER = [
    "sa_wqkv", "sa_bqkv", "sa_wo", "sa_bo",
    "ca_wq", "ca_bq", "ca_wkv", "ca_bkv", "ca_wo", "ca_bo",
    "ffn_w1", "ffn_b1", "ffn_w2", "ffn_b2",
    "ln1_g", "ln1_b", "ln2_g", "ln2_b", "ln3_g", "ln3_b",
]


def decoder_block(x, encoder_out, input_mask, output_mask, params, *, n_heads, eps):
    B, T, D = x.shape
    S = encoder_out.shape[1]
    bf16 = jnp.bfloat16

    # Pack / cast weights: fused QKV (self) and fused KV (cross) in bf16; biases and
    # layer-norm params stay f32 (they add to / scale f32 accumulators).
    packed = {
        "sa_wqkv": jnp.concatenate(
            [params["sa_wq"], params["sa_wk"], params["sa_wv"]], axis=1).astype(bf16),
        "sa_bqkv": jnp.concatenate(
            [params["sa_bq"], params["sa_bk"], params["sa_bv"]], axis=1),
        "sa_wo": params["sa_wo"].astype(bf16), "sa_bo": params["sa_bo"],
        "ca_wq": params["ca_wq"].astype(bf16), "ca_bq": params["ca_bq"],
        "ca_wkv": jnp.concatenate(
            [params["ca_wk"], params["ca_wv"]], axis=1).astype(bf16),
        "ca_bkv": jnp.concatenate([params["ca_bk"], params["ca_bv"]], axis=1),
        "ca_wo": params["ca_wo"].astype(bf16), "ca_bo": params["ca_bo"],
        "ffn_w1": params["ffn_w1"].astype(bf16), "ffn_b1": params["ffn_b1"],
        "ffn_w2": params["ffn_w2"].astype(bf16), "ffn_b2": params["ffn_b2"],
        "ln1_g": params["ln1_g"], "ln1_b": params["ln1_b"],
        "ln2_g": params["ln2_g"], "ln2_b": params["ln2_b"],
        "ln3_g": params["ln3_g"], "ln3_b": params["ln3_b"],
    }
    weights = [packed[k] for k in PARAM_ORDER]

    def batched(shape):
        n = len(shape)
        return pl.BlockSpec((1,) + shape, lambda b, _n=n: (b,) + (0,) * _n)

    def full(shape):
        n = len(shape)
        return pl.BlockSpec(shape, lambda b, _n=n: (0,) * _n)

    in_specs = [batched((T, D)), batched((S, D)), batched((T, T)), batched((T, S))]
    in_specs += [full(w.shape) for w in weights]

    kernel = functools.partial(decoder_block_kernel, n_heads=n_heads, eps=eps)
    return pl.pallas_call(
        kernel,
        out_shape=jax.ShapeDtypeStruct((B, T, D), x.dtype),
        grid=(B,),
        in_specs=in_specs,
        out_specs=pl.BlockSpec((1, T, D), lambda b: (b, 0, 0)),
        scratch_shapes=[pltpu.VMEM((T, D), jnp.float32)],   # per-step head-output buffer
        compiler_params=pltpu.CompilerParams(dimension_semantics=("parallel",)),
    )(x, encoder_out, output_mask, input_mask, *weights)


# ------------------------------ param init -----------------------------------

def init_params(key, embed_dim, ffn_dim):
    keys = iter(jax.random.split(key, 64))
    p = {}

    def lin(fan_in, fan_out):
        w = jax.random.normal(next(keys), (fan_in, fan_out), jnp.float32) / jnp.sqrt(fan_in)
        b = 0.01 * jax.random.normal(next(keys), (1, fan_out), jnp.float32)
        return w, b

    for pre in ("sa_", "ca_"):
        for name in ("q", "k", "v", "o"):
            w, b = lin(embed_dim, embed_dim)
            p[pre + "w" + name] = w
            p[pre + "b" + name] = b
    p["ffn_w1"], p["ffn_b1"] = lin(embed_dim, ffn_dim)
    p["ffn_w2"], p["ffn_b2"] = lin(ffn_dim, embed_dim)
    for i in (1, 2, 3):
        p[f"ln{i}_g"] = 1.0 + 0.05 * jax.random.normal(next(keys), (1, embed_dim), jnp.float32)
        p[f"ln{i}_b"] = 0.05 * jax.random.normal(next(keys), (1, embed_dim), jnp.float32)
    return p


# ------------------------- pure-JAX reference (check) -------------------------

def ref_decoder_block(x, enc, input_mask, output_mask, p, *, n_heads, eps):
    def ln(v, g, b):
        mu = v.mean(-1, keepdims=True)
        var = ((v - mu) ** 2).mean(-1, keepdims=True)
        return (v - mu) / jnp.sqrt(var + eps) * g + b

    def mha(q_in, k_in, v_in, mask, pre):
        B, Tq, D = q_in.shape
        Tk = k_in.shape[1]
        hd = D // n_heads
        q = q_in @ p[pre + "wq"] + p[pre + "bq"]
        k = k_in @ p[pre + "wk"] + p[pre + "bk"]
        v = v_in @ p[pre + "wv"] + p[pre + "bv"]
        q = q.reshape(B, Tq, n_heads, hd).transpose(0, 2, 1, 3)
        k = k.reshape(B, Tk, n_heads, hd).transpose(0, 2, 1, 3)
        v = v.reshape(B, Tk, n_heads, hd).transpose(0, 2, 1, 3)
        s = jnp.einsum("bhqd,bhkd->bhqk", q, k) / jnp.sqrt(hd)
        s = jnp.where(mask[:, None] > 0, s, -1e9)
        a = jax.nn.softmax(s, -1)
        o = jnp.einsum("bhqk,bhkd->bhqd", a, v).transpose(0, 2, 1, 3).reshape(B, Tq, D)
        return o @ p[pre + "wo"] + p[pre + "bo"]

    h = ln(mha(x, x, x, output_mask, "sa_") + x, p["ln1_g"], p["ln1_b"])
    h = ln(mha(h, enc, enc, input_mask, "ca_") + h, p["ln2_g"], p["ln2_b"])
    f = jnp.maximum(h @ p["ffn_w1"] + p["ffn_b1"], 0.0) @ p["ffn_w2"] + p["ffn_b2"]
    return ln(f + h, p["ln3_g"], p["ln3_b"])


# ----------------------------------- main -------------------------------------

if __name__ == "__main__":
    B, T, S, D, H, F = 2, 8, 8, 32, 4, 64
    eps = 1e-5

    root = jax.random.PRNGKey(0)
    kx, kenc, kp = jax.random.split(root, 3)

    x = jax.random.normal(kx, (B, T, D), jnp.float32)
    encoder_out = jax.random.normal(kenc, (B, S, D), jnp.float32)

    # causal mask for self-attention, padding-style mask for cross-attention
    output_mask = jnp.broadcast_to(jnp.tril(jnp.ones((T, T), jnp.float32)), (B, T, T))
    input_mask = jnp.ones((B, T, S), jnp.float32).at[1, :, -2:].set(0.0)

    params = init_params(kp, D, F)

    out = decoder_block(x, encoder_out, input_mask, output_mask, params, n_heads=H, eps=eps)
    out = jax.block_until_ready(out)

    # Accurate f32 reference (scoped precision, no global side effect).
    with jax.default_matmul_precision("highest"):
        ref = ref_decoder_block(x, encoder_out, input_mask, output_mask, params,
                                n_heads=H, eps=eps)
        ref = jax.block_until_ready(ref)

    assert out.shape == (B, T, D)
    # Kernel uses bf16 MXU operands with f32 accumulation (typical max abs err ~1e-2
    # at these shapes); tolerance reflects the bf16 compute path.
    max_err = float(jnp.max(jnp.abs(out - ref)))
    assert jnp.allclose(out, ref, rtol=5e-2, atol=5e-2), max_err

    print("KERNEL_OK")
</pallas_src>

<mosaic_0001>
module attributes {stable_mosaic.version = 11 : i64} {
  func.func @decoder_block_kernel(%arg0: i32, %arg1: memref<1x8x32xf32, #tpu.memory_space<vmem>>, %arg2: memref<1x8x32xf32, #tpu.memory_space<vmem>>, %arg3: memref<1x8x8xf32, #tpu.memory_space<vmem>>, %arg4: memref<1x8x8xf32, #tpu.memory_space<vmem>>, %arg5: memref<32x96xbf16, #tpu.memory_space<vmem>>, %arg6: memref<1x96xf32, #tpu.memory_space<vmem>>, %arg7: memref<32x32xbf16, #tpu.memory_space<vmem>>, %arg8: memref<1x32xf32, #tpu.memory_space<vmem>>, %arg9: memref<32x32xbf16, #tpu.memory_space<vmem>>, %arg10: memref<1x32xf32, #tpu.memory_space<vmem>>, %arg11: memref<32x64xbf16, #tpu.memory_space<vmem>>, %arg12: memref<1x64xf32, #tpu.memory_space<vmem>>, %arg13: memref<32x32xbf16, #tpu.memory_space<vmem>>, %arg14: memref<1x32xf32, #tpu.memory_space<vmem>>, %arg15: memref<32x64xbf16, #tpu.memory_space<vmem>>, %arg16: memref<1x64xf32, #tpu.memory_space<vmem>>, %arg17: memref<64x32xbf16, #tpu.memory_space<vmem>>, %arg18: memref<1x32xf32, #tpu.memory_space<vmem>>, %arg19: memref<1x32xf32, #tpu.memory_space<vmem>>, %arg20: memref<1x32xf32, #tpu.memory_space<vmem>>, %arg21: memref<1x32xf32, #tpu.memory_space<vmem>>, %arg22: memref<1x32xf32, #tpu.memory_space<vmem>>, %arg23: memref<1x32xf32, #tpu.memory_space<vmem>>, %arg24: memref<1x32xf32, #tpu.memory_space<vmem>>, %arg25: memref<1x8x32xf32, #tpu.memory_space<vmem>>, %arg26: memref<8x32xf32, #tpu.memory_space<vmem>>) attributes {dimension_semantics = [#tpu.dimension_semantics<parallel>], iteration_bounds = array<i64: 2>, scalar_prefetch = 0 : i64, scratch_operands = 1 : i64, tpu.core_type = #tpu.core_type<tc>, window_params = [{transform_indices = @transform_0, window_bounds = array<i64: 1, 8, 32>}, {transform_indices = @transform_1, window_bounds = array<i64: 1, 8, 32>}, {transform_indices = @transform_2, window_bounds = array<i64: 1, 8, 8>}, {transform_indices = @transform_3, window_bounds = array<i64: 1, 8, 8>}, {pipeline_mode = #tpu.pipeline_mode<synchronous>, transform_indices = @transform_4, window_bounds = array<i64: 32, 96>}, {pipeline_mode = #tpu.pipeline_mode<synchronous>, transform_indices = @transform_5, window_bounds = array<i64: 1, 96>}, {pipeline_mode = #tpu.pipeline_mode<synchronous>, transform_indices = @transform_6, window_bounds = array<i64: 32, 32>}, {pipeline_mode = #tpu.pipeline_mode<synchronous>, transform_indices = @transform_7, window_bounds = array<i64: 1, 32>}, {pipeline_mode = #tpu.pipeline_mode<synchronous>, transform_indices = @transform_8, window_bounds = array<i64: 32, 32>}, {pipeline_mode = #tpu.pipeline_mode<synchronous>, transform_indices = @transform_9, window_bounds = array<i64: 1, 32>}, {pipeline_mode = #tpu.pipeline_mode<synchronous>, transform_indices = @transform_10, window_bounds = array<i64: 32, 64>}, {pipeline_mode = #tpu.pipeline_mode<synchronous>, transform_indices = @transform_11, window_bounds = array<i64: 1, 64>}, {pipeline_mode = #tpu.pipeline_mode<synchronous>, transform_indices = @transform_12, window_bounds = array<i64: 32, 32>}, {pipeline_mode = #tpu.pipeline_mode<synchronous>, transform_indices = @transform_13, window_bounds = array<i64: 1, 32>}, {pipeline_mode = #tpu.pipeline_mode<synchronous>, transform_indices = @transform_14, window_bounds = array<i64: 32, 64>}, {pipeline_mode = #tpu.pipeline_mode<synchronous>, transform_indices = @transform_15, window_bounds = array<i64: 1, 64>}, {pipeline_mode = #tpu.pipeline_mode<synchronous>, transform_indices = @transform_16, window_bounds = array<i64: 64, 32>}, {pipeline_mode = #tpu.pipeline_mode<synchronous>, transform_indices = @transform_17, window_bounds = array<i64: 1, 32>}, {pipeline_mode = #tpu.pipeline_mode<synchronous>, transform_indices = @transform_18, window_bounds = array<i64: 1, 32>}, {pipeline_mode = #tpu.pipeline_mode<synchronous>, transform_indices = @transform_19, window_bounds = array<i64: 1, 32>}, {pipeline_mode = #tpu.pipeline_mode<synchronous>, transform_indices = @transform_20, window_bounds = array<i64: 1, 32>}, {pipeline_mode = #tpu.pipeline_mode<synchronous>, transform_indices = @transform_21, window_bounds = array<i64: 1, 32>}, {pipeline_mode = #tpu.pipeline_mode<synchronous>, transform_indices = @transform_22, window_bounds = array<i64: 1, 32>}, {pipeline_mode = #tpu.pipeline_mode<synchronous>, transform_indices = @transform_23, window_bounds = array<i64: 1, 32>}, {transform_indices = @transform_24, window_bounds = array<i64: 1, 8, 32>}]} {
    %c0 = arith.constant 0 : index
    %c0_0 = arith.constant 0 : index
    %c0_1 = arith.constant 0 : index
    %0 = vector.load %arg1[%c0, %c0_0, %c0_1] : memref<1x8x32xf32, #tpu.memory_space<vmem>>, vector<1x8x32xf32>
    %1 = vector.shape_cast %0 : vector<1x8x32xf32> to vector<8x32xf32>
    %c0_2 = arith.constant 0 : index
    %c0_3 = arith.constant 0 : index
    %c0_4 = arith.constant 0 : index
    %2 = vector.load %arg2[%c0_2, %c0_3, %c0_4] : memref<1x8x32xf32, #tpu.memory_space<vmem>>, vector<1x8x32xf32>
    %3 = vector.shape_cast %2 : vector<1x8x32xf32> to vector<8x32xf32>
    %4 = arith.truncf %3 : vector<8x32xf32> to vector<8x32xbf16>
    %c0_5 = arith.constant 0 : index
    %c0_6 = arith.constant 0 : index
    %c0_7 = arith.constant 0 : index
    %5 = vector.load %arg3[%c0_5, %c0_6, %c0_7] : memref<1x8x8xf32, #tpu.memory_space<vmem>>, vector<1x8x8xf32>
    %6 = vector.shape_cast %5 : vector<1x8x8xf32> to vector<8x8xf32>
    %c0_8 = arith.constant 0 : index
    %c0_9 = arith.constant 0 : index
    %c0_10 = arith.constant 0 : index
    %7 = vector.load %arg4[%c0_8, %c0_9, %c0_10] : memref<1x8x8xf32, #tpu.memory_space<vmem>>, vector<1x8x8xf32>
    %8 = vector.shape_cast %7 : vector<1x8x8xf32> to vector<8x8xf32>
    %9 = arith.truncf %1 : vector<8x32xf32> to vector<8x32xbf16>
    %c0_11 = arith.constant 0 : index
    %c0_12 = arith.constant 0 : index
    %10 = vector.load %arg5[%c0_11, %c0_12] : memref<32x96xbf16, #tpu.memory_space<vmem>>, vector<32x96xbf16>
    %cst = arith.constant dense<0.000000e+00> : vector<8x96xf32>
    %11 = tpu.matmul %9, %10, %cst {dimension_numbers = #tpu.dot_dimension_numbers<[1], [0], [0], [1], [0, 0, 1, 1], [], []>} : vector<8x32xbf16>, vector<32x96xbf16>, vector<8x96xf32> -> vector<8x96xf32>
    %c0_13 = arith.constant 0 : index
    %c0_14 = arith.constant 0 : index
    %12 = vector.load %arg6[%c0_13, %c0_14] : memref<1x96xf32, #tpu.memory_space<vmem>>, vector<1x96xf32>
    %13 = vector.broadcast %12 : vector<1x96xf32> to vector<8x96xf32>
    %14 = arith.addf %11, %13 : vector<8x96xf32>
    %15 = vector.extract_strided_slice %14 {offsets = [0, 0], sizes = [8, 32], strides = [1, 1]} : vector<8x96xf32> to vector<8x32xf32>
    %16 = vector.extract_strided_slice %14 {offsets = [0, 32], sizes = [8, 32], strides = [1, 1]} : vector<8x96xf32> to vector<8x32xf32>
    %17 = vector.extract_strided_slice %14 {offsets = [0, 64], sizes = [8, 32], strides = [1, 1]} : vector<8x96xf32> to vector<8x32xf32>
    %cst_15 = arith.constant 0.353553385 : f32
    %18 = vector.broadcast %cst_15 : f32 to vector<8x32xf32>
    %19 = arith.mulf %15, %18 : vector<8x32xf32>
    %20 = arith.truncf %19 : vector<8x32xf32> to vector<8x32xbf16>
    %21 = arith.truncf %16 : vector<8x32xf32> to vector<8x32xbf16>
    %22 = arith.truncf %17 : vector<8x32xf32> to vector<8x32xbf16>
    %23 = vector.extract_strided_slice %20 {offsets = [0, 0], sizes = [8, 8], strides = [1, 1]} : vector<8x32xbf16> to vector<8x8xbf16>
    %24 = vector.extract_strided_slice %21 {offsets = [0, 0], sizes = [8, 8], strides = [1, 1]} : vector<8x32xbf16> to vector<8x8xbf16>
    %25 = vector.extract_strided_slice %22 {offsets = [0, 0], sizes = [8, 8], strides = [1, 1]} : vector<8x32xbf16> to vector<8x8xbf16>
    %cst_16 = arith.constant dense<0.000000e+00> : vector<8x8xf32>
    %26 = tpu.matmul %23, %24, %cst_16 {dimension_numbers = #tpu.dot_dimension_numbers<[1], [1], [0], [0], [0, 0, 1, 0], [], []>} : vector<8x8xbf16>, vector<8x8xbf16>, vector<8x8xf32> -> vector<8x8xf32>
    %cst_17 = arith.constant 0.000000e+00 : f32
    %27 = vector.broadcast %cst_17 : f32 to vector<8x8xf32>
    %28 = arith.cmpf ogt, %6, %27 : vector<8x8xf32>
    %cst_18 = arith.constant -1.000000e+09 : f32
    %29 = vector.broadcast %cst_18 : f32 to vector<8x8xf32>
    %30 = arith.select %28, %26, %29 : vector<8x8xi1>, vector<8x8xf32>
    %cst_19 = arith.constant dense<0xFF800000> : vector<8xf32>
    %31 = vector.multi_reduction <maximumf>, %30, %cst_19 [1] : vector<8x8xf32> to vector<8xf32>
    %32 = vector.shape_cast %31 : vector<8xf32> to vector<8x1xf32>
    %33 = vector.broadcast %32 : vector<8x1xf32> to vector<8x8xf32>
    %34 = arith.subf %30, %33 : vector<8x8xf32>
    %35 = math.exp %34 : vector<8x8xf32>
    %cst_20 = arith.constant dense<0.000000e+00> : vector<8xf32>
    %36 = vector.multi_reduction <add>, %35, %cst_20 [1] : vector<8x8xf32> to vector<8xf32>
    %37 = vector.shape_cast %36 : vector<8xf32> to vector<8x1xf32>
    %38 = tpu.reciprocal %37 {approx = true} : vector<8x1xf32> -> vector<8x1xf32>
    %39 = vector.broadcast %38 : vector<8x1xf32> to vector<8x8xf32>
    %40 = arith.mulf %35, %39 : vector<8x8xf32>
    %41 = arith.truncf %40 : vector<8x8xf32> to vector<8x8xbf16>
    %cst_21 = arith.constant dense<0.000000e+00> : vector<8x8xf32>
    %42 = tpu.matmul %41, %25, %cst_21 {dimension_numbers = #tpu.dot_dimension_numbers<[1], [0], [0], [1], [0, 0, 1, 1], [], []>} : vector<8x8xbf16>, vector<8x8xbf16>, vector<8x8xf32> -> vector<8x8xf32>
    %c0_22 = arith.constant 0 : index
    %c0_23 = arith.constant 0 : index
    %43 = vector.load %arg26[%c0_22, %c0_23] : memref<8x32xf32, #tpu.memory_space<vmem>>, vector<8x8xf32>
    tpu.vector_store %arg26[%c0_22, %c0_23], %42 {strides = array<i32>} : memref<8x32xf32, #tpu.memory_space<vmem>>, vector<8x8xf32>,
    %44 = vector.extract_strided_slice %20 {offsets = [0, 8], sizes = [8, 8], strides = [1, 1]} : vector<8x32xbf16> to vector<8x8xbf16>
    %45 = vector.extract_strided_slice %21 {offsets = [0, 8], sizes = [8, 8], strides = [1, 1]} : vector<8x32xbf16> to vector<8x8xbf16>
    %46 = vector.extract_strided_slice %22 {offsets = [0, 8], sizes = [8, 8], strides = [1, 1]} : vector<8x32xbf16> to vector<8x8xbf16>
    %cst_24 = arith.constant dense<0.000000e+00> : vector<8x8xf32>
    %47 = tpu.matmul %44, %45, %cst_24 {dimension_numbers = #tpu.dot_dimension_numbers<[1], [1], [0], [0], [0, 0, 1, 0], [], []>} : vector<8x8xbf16>, vector<8x8xbf16>, vector<8x8xf32> -> vector<8x8xf32>
    %cst_25 = arith.constant 0.000000e+00 : f32
    %48 = vector.broadcast %cst_25 : f32 to vector<8x8xf32>
    %49 = arith.cmpf ogt, %6, %48 : vector<8x8xf32>
    %cst_26 = arith.constant -1.000000e+09 : f32
    %50 = vector.broadcast %cst_26 : f32 to vector<8x8xf32>
    %51 = arith.select %49, %47, %50 : vector<8x8xi1>, vector<8x8xf32>
    %cst_27 = arith.constant dense<0xFF800000> : vector<8xf32>
    %52 = vector.multi_reduction <maximumf>, %51, %cst_27 [1] : vector<8x8xf32> to vector<8xf32>
    %53 = vector.shape_cast %52 : vector<8xf32> to vector<8x1xf32>
    %54 = vector.broadcast %53 : vector<8x1xf32> to vector<8x8xf32>
    %55 = arith.subf %51, %54 : vector<8x8xf32>
    %56 = math.exp %55 : vector<8x8xf32>
    %cst_28 = arith.constant dense<0.000000e+00> : vector<8xf32>
    %57 = vector.multi_reduction <add>, %56, %cst_28 [1] : vector<8x8xf32> to vector<8xf32>
    %58 = vector.shape_cast %57 : vector<8xf32> to vector<8x1xf32>
    %59 = tpu.reciprocal %58 {approx = true} : vector<8x1xf32> -> vector<8x1xf32>
    %60 = vector.broadcast %59 : vector<8x1xf32> to vector<8x8xf32>
    %61 = arith.mulf %56, %60 : vector<8x8xf32>
    %62 = arith.truncf %61 : vector<8x8xf32> to vector<8x8xbf16>
    %cst_29 = arith.constant dense<0.000000e+00> : vector<8x8xf32>
    %63 = tpu.matmul %62, %46, %cst_29 {dimension_numbers = #tpu.dot_dimension_numbers<[1], [0], [0], [1], [0, 0, 1, 1], [], []>} : vector<8x8xbf16>, vector<8x8xbf16>, vector<8x8xf32> -> vector<8x8xf32>
    %c0_30 = arith.constant 0 : index
    %c8 = arith.constant 8 : index
    %64 = vector.load %arg26[%c0_30, %c8] : memref<8x32xf32, #tpu.memory_space<vmem>>, vector<8x8xf32>
    tpu.vector_store %arg26[%c0_30, %c8], %63 {strides = array<i32>} : memref<8x32xf32, #tpu.memory_space<vmem>>, vector<8x8xf32>,
    %65 = vector.extract_strided_slice %20 {offsets = [0, 16], sizes = [8, 8], strides = [1, 1]} : vector<8x32xbf16> to vector<8x8xbf16>
    %66 = vector.extract_strided_slice %21 {offsets = [0, 16], sizes = [8, 8], strides = [1, 1]} : vector<8x32xbf16> to vector<8x8xbf16>
    %67 = vector.extract_strided_slice %22 {offsets = [0, 16], sizes = [8, 8], strides = [1, 1]} : vector<8x32xbf16> to vector<8x8xbf16>
    %cst_31 = arith.constant dense<0.000000e+00> : vector<8x8xf32>
    %68 = tpu.matmul %65, %66, %cst_31 {dimension_numbers = #tpu.dot_dimension_numbers<[1], [1], [0], [0], [0, 0, 1, 0], [], []>} : vector<8x8xbf16>, vector<8x8xbf16>, vector<8x8xf32> -> vector<8x8xf32>
    %cst_32 = arith.constant 0.000000e+00 : f32
    %69 = vector.broadcast %cst_32 : f32 to vector<8x8xf32>
    %70 = arith.cmpf ogt, %6, %69 : vector<8x8xf32>
    %cst_33 = arith.constant -1.000000e+09 : f32
    %71 = vector.broadcast %cst_33 : f32 to vector<8x8xf32>
    %72 = arith.select %70, %68, %71 : vector<8x8xi1>, vector<8x8xf32>
    %cst_34 = arith.constant dense<0xFF800000> : vector<8xf32>
    %73 = vector.multi_reduction <maximumf>, %72, %cst_34 [1] : vector<8x8xf32> to vector<8xf32>
    %74 = vector.shape_cast %73 : vector<8xf32> to vector<8x1xf32>
    %75 = vector.broadcast %74 : vector<8x1xf32> to vector<8x8xf32>
    %76 = arith.subf %72, %75 : vector<8x8xf32>
    %77 = math.exp %76 : vector<8x8xf32>
    %cst_35 = arith.constant dense<0.000000e+00> : vector<8xf32>
    %78 = vector.multi_reduction <add>, %77, %cst_35 [1] : vector<8x8xf32> to vector<8xf32>
    %79 = vector.shape_cast %78 : vector<8xf32> to vector<8x1xf32>
    %80 = tpu.reciprocal %79 {approx = true} : vector<8x1xf32> -> vector<8x1xf32>
    %81 = vector.broadcast %80 : vector<8x1xf32> to vector<8x8xf32>
    %82 = arith.mulf %77, %81 : vector<8x8xf32>
    %83 = arith.truncf %82 : vector<8x8xf32> to vector<8x8xbf16>
    %cst_36 = arith.constant dense<0.000000e+00> : vector<8x8xf32>
    %84 = tpu.matmul %83, %67, %cst_36 {dimension_numbers = #tpu.dot_dimension_numbers<[1], [0], [0], [1], [0, 0, 1, 1], [], []>} : vector<8x8xbf16>, vector<8x8xbf16>, vector<8x8xf32> -> vector<8x8xf32>
    %c0_37 = arith.constant 0 : index
    %c16 = arith.constant 16 : index
    %85 = vector.load %arg26[%c0_37, %c16] : memref<8x32xf32, #tpu.memory_space<vmem>>, vector<8x8xf32>
    tpu.vector_store %arg26[%c0_37, %c16], %84 {strides = array<i32>} : memref<8x32xf32, #tpu.memory_space<vmem>>, vector<8x8xf32>,
    %86 = vector.extract_strided_slice %20 {offsets = [0, 24], sizes = [8, 8], strides = [1, 1]} : vector<8x32xbf16> to vector<8x8xbf16>
    %87 = vector.extract_strided_slice %21 {offsets = [0, 24], sizes = [8, 8], strides = [1, 1]} : vector<8x32xbf16> to vector<8x8xbf16>
    %88 = vector.extract_strided_slice %22 {offsets = [0, 24], sizes = [8, 8], strides = [1, 1]} : vector<8x32xbf16> to vector<8x8xbf16>
    %cst_38 = arith.constant dense<0.000000e+00> : vector<8x8xf32>
    %89 = tpu.matmul %86, %87, %cst_38 {dimension_numbers = #tpu.dot_dimension_numbers<[1], [1], [0], [0], [0, 0, 1, 0], [], []>} : vector<8x8xbf16>, vector<8x8xbf16>, vector<8x8xf32> -> vector<8x8xf32>
    %cst_39 = arith.constant 0.000000e+00 : f32
    %90 = vector.broadcast %cst_39 : f32 to vector<8x8xf32>
    %91 = arith.cmpf ogt, %6, %90 : vector<8x8xf32>
    %cst_40 = arith.constant -1.000000e+09 : f32
    %92 = vector.broadcast %cst_40 : f32 to vector<8x8xf32>
    %93 = arith.select %91, %89, %92 : vector<8x8xi1>, vector<8x8xf32>
    %cst_41 = arith.constant dense<0xFF800000> : vector<8xf32>
    %94 = vector.multi_reduction <maximumf>, %93, %cst_41 [1] : vector<8x8xf32> to vector<8xf32>
    %95 = vector.shape_cast %94 : vector<8xf32> to vector<8x1xf32>
    %96 = vector.broadcast %95 : vector<8x1xf32> to vector<8x8xf32>
    %97 = arith.subf %93, %96 : vector<8x8xf32>
    %98 = math.exp %97 : vector<8x8xf32>
    %cst_42 = arith.constant dense<0.000000e+00> : vector<8xf32>
    %99 = vector.multi_reduction <add>, %98, %cst_42 [1] : vector<8x8xf32> to vector<8xf32>
    %100 = vector.shape_cast %99 : vector<8xf32> to vector<8x1xf32>
    %101 = tpu.reciprocal %100 {approx = true} : vector<8x1xf32> -> vector<8x1xf32>
    %102 = vector.broadcast %101 : vector<8x1xf32> to vector<8x8xf32>
    %103 = arith.mulf %98, %102 : vector<8x8xf32>
    %104 = arith.truncf %103 : vector<8x8xf32> to vector<8x8xbf16>
    %cst_43 = arith.constant dense<0.000000e+00> : vector<8x8xf32>
    %105 = tpu.matmul %104, %88, %cst_43 {dimension_numbers = #tpu.dot_dimension_numbers<[1], [0], [0], [1], [0, 0, 1, 1], [], []>} : vector<8x8xbf16>, vector<8x8xbf16>, vector<8x8xf32> -> vector<8x8xf32>
    %c0_44 = arith.constant 0 : index
    %c24 = arith.constant 24 : index
    %106 = vector.load %arg26[%c0_44, %c24] : memref<8x32xf32, #tpu.memory_space<vmem>>, vector<8x8xf32>
    tpu.vector_store %arg26[%c0_44, %c24], %105 {strides = array<i32>} : memref<8x32xf32, #tpu.memory_space<vmem>>, vector<8x8xf32>,
    %c0_45 = arith.constant 0 : index
    %c0_46 = arith.constant 0 : index
    %107 = vector.load %arg26[%c0_45, %c0_46] : memref<8x32xf32, #tpu.memory_space<vmem>>, vector<8x32xf32>
    %108 = arith.truncf %107 : vector<8x32xf32> to vector<8x32xbf16>
    %c0_47 = arith.constant 0 : index
    %c0_48 = arith.constant 0 : index
    %109 = vector.load %arg7[%c0_47, %c0_48] : memref<32x32xbf16, #tpu.memory_space<vmem>>, vector<32x32xbf16>
    %cst_49 = arith.constant dense<0.000000e+00> : vector<8x32xf32>
    %110 = tpu.matmul %108, %109, %cst_49 {dimension_numbers = #tpu.dot_dimension_numbers<[1], [0], [0], [1], [0, 0, 1, 1], [], []>} : vector<8x32xbf16>, vector<32x32xbf16>, vector<8x32xf32> -> vector<8x32xf32>
    %c0_50 = arith.constant 0 : index
    %c0_51 = arith.constant 0 : index
    %111 = vector.load %arg8[%c0_50, %c0_51] : memref<1x32xf32, #tpu.memory_space<vmem>>, vector<1x32xf32>
    %112 = vector.broadcast %111 : vector<1x32xf32> to vector<8x32xf32>
    %113 = arith.addf %110, %112 : vector<8x32xf32>
    %114 = arith.addf %1, %113 : vector<8x32xf32>
    %c0_52 = arith.constant 0 : index
    %c0_53 = arith.constant 0 : index
    %115 = vector.load %arg19[%c0_52, %c0_53] : memref<1x32xf32, #tpu.memory_space<vmem>>, vector<1x32xf32>
    %c0_54 = arith.constant 0 : index
    %c0_55 = arith.constant 0 : index
    %116 = vector.load %arg20[%c0_54, %c0_55] : memref<1x32xf32, #tpu.memory_space<vmem>>, vector<1x32xf32>
    %cst_56 = arith.constant dense<0.000000e+00> : vector<8xf32>
    %117 = vector.multi_reduction <add>, %114, %cst_56 [1] : vector<8x32xf32> to vector<8xf32>
    %118 = vector.shape_cast %117 : vector<8xf32> to vector<8x1xf32>
    %cst_57 = arith.constant 3.200000e+01 : f32
    %119 = vector.broadcast %cst_57 : f32 to vector<8x1xf32>
    %120 = arith.divf %118, %119 : vector<8x1xf32>
    %121 = vector.broadcast %120 : vector<8x1xf32> to vector<8x32xf32>
    %122 = arith.subf %114, %121 : vector<8x32xf32>
    %123 = arith.mulf %122, %122 : vector<8x32xf32>
    %cst_58 = arith.constant dense<0.000000e+00> : vector<8xf32>
    %124 = vector.multi_reduction <add>, %123, %cst_58 [1] : vector<8x32xf32> to vector<8xf32>
    %125 = vector.shape_cast %124 : vector<8xf32> to vector<8x1xf32>
    %cst_59 = arith.constant 3.200000e+01 : f32
    %126 = vector.broadcast %cst_59 : f32 to vector<8x1xf32>
    %127 = arith.divf %125, %126 : vector<8x1xf32>
    %128 = vector.broadcast %120 : vector<8x1xf32> to vector<8x32xf32>
    %129 = arith.subf %114, %128 : vector<8x32xf32>
    %cst_60 = arith.constant 9.99999974E-6 : f32
    %130 = vector.broadcast %cst_60 : f32 to vector<8x1xf32>
    %131 = arith.addf %127, %130 : vector<8x1xf32>
    %132 = math.rsqrt %131 : vector<8x1xf32>
    %133 = vector.broadcast %132 : vector<8x1xf32> to vector<8x32xf32>
    %134 = arith.mulf %129, %133 : vector<8x32xf32>
    %135 = vector.broadcast %115 : vector<1x32xf32> to vector<8x32xf32>
    %136 = arith.mulf %134, %135 : vector<8x32xf32>
    %137 = vector.broadcast %116 : vector<1x32xf32> to vector<8x32xf32>
    %138 = arith.addf %136, %137 : vector<8x32xf32>
    %139 = arith.truncf %138 : vector<8x32xf32> to vector<8x32xbf16>
    %c0_61 = arith.constant 0 : index
    %c0_62 = arith.constant 0 : index
    %140 = vector.load %arg9[%c0_61, %c0_62] : memref<32x32xbf16, #tpu.memory_space<vmem>>, vector<32x32xbf16>
    %cst_63 = arith.constant dense<0.000000e+00> : vector<8x32xf32>
    %141 = tpu.matmul %139, %140, %cst_63 {dimension_numbers = #tpu.dot_dimension_numbers<[1], [0], [0], [1], [0, 0, 1, 1], [], []>} : vector<8x32xbf16>, vector<32x32xbf16>, vector<8x32xf32> -> vector<8x32xf32>
    %c0_64 = arith.constant 0 : index
    %c0_65 = arith.constant 0 : index
    %142 = vector.load %arg10[%c0_64, %c0_65] : memref<1x32xf32, #tpu.memory_space<vmem>>, vector<1x32xf32>
    %143 = vector.broadcast %142 : vector<1x32xf32> to vector<8x32xf32>
    %144 = arith.addf %141, %143 : vector<8x32xf32>
    %c0_66 = arith.constant 0 : index
    %c0_67 = arith.constant 0 : index
    %145 = vector.load %arg11[%c0_66, %c0_67] : memref<32x64xbf16, #tpu.memory_space<vmem>>, vector<32x64xbf16>
    %cst_68 = arith.constant dense<0.000000e+00> : vector<8x64xf32>
    %146 = tpu.matmul %4, %145, %cst_68 {dimension_numbers = #tpu.dot_dimension_numbers<[1], [0], [0], [1], [0, 0, 1, 1], [], []>} : vector<8x32xbf16>, vector<32x64xbf16>, vector<8x64xf32> -> vector<8x64xf32>
    %c0_69 = arith.constant 0 : index
    %c0_70 = arith.constant 0 : index
    %147 = vector.load %arg12[%c0_69, %c0_70] : memref<1x64xf32, #tpu.memory_space<vmem>>, vector<1x64xf32>
    %148 = vector.broadcast %147 : vector<1x64xf32> to vector<8x64xf32>
    %149 = arith.addf %146, %148 : vector<8x64xf32>
    %150 = vector.extract_strided_slice %149 {offsets = [0, 0], sizes = [8, 32], strides = [1, 1]} : vector<8x64xf32> to vector<8x32xf32>
    %151 = vector.extract_strided_slice %149 {offsets = [0, 32], sizes = [8, 32], strides = [1, 1]} : vector<8x64xf32> to vector<8x32xf32>
    %cst_71 = arith.constant 0.353553385 : f32
    %152 = vector.broadcast %cst_71 : f32 to vector<8x32xf32>
    %153 = arith.mulf %144, %152 : vector<8x32xf32>
    %154 = arith.truncf %153 : vector<8x32xf32> to vector<8x32xbf16>
    %155 = arith.truncf %150 : vector<8x32xf32> to vector<8x32xbf16>
    %156 = arith.truncf %151 : vector<8x32xf32> to vector<8x32xbf16>
    %157 = vector.extract_strided_slice %154 {offsets = [0, 0], sizes = [8, 8], strides = [1, 1]} : vector<8x32xbf16> to vector<8x8xbf16>
    %158 = vector.extract_strided_slice %155 {offsets = [0, 0], sizes = [8, 8], strides = [1, 1]} : vector<8x32xbf16> to vector<8x8xbf16>
    %159 = vector.extract_strided_slice %156 {offsets = [0, 0], sizes = [8, 8], strides = [1, 1]} : vector<8x32xbf16> to vector<8x8xbf16>
    %cst_72 = arith.constant dense<0.000000e+00> : vector<8x8xf32>
    %160 = tpu.matmul %157, %158, %cst_72 {dimension_numbers = #tpu.dot_dimension_numbers<[1], [1], [0], [0], [0, 0, 1, 0], [], []>} : vector<8x8xbf16>, vector<8x8xbf16>, vector<8x8xf32> -> vector<8x8xf32>
    %cst_73 = arith.constant 0.000000e+00 : f32
    %161 = vector.broadcast %cst_73 : f32 to vector<8x8xf32>
    %162 = arith.cmpf ogt, %8, %161 : vector<8x8xf32>
    %cst_74 = arith.constant -1.000000e+09 : f32
    %163 = vector.broadcast %cst_74 : f32 to vector<8x8xf32>
    %164 = arith.select %162, %160, %163 : vector<8x8xi1>, vector<8x8xf32>
    %cst_75 = arith.constant dense<0xFF800000> : vector<8xf32>
    %165 = vector.multi_reduction <maximumf>, %164, %cst_75 [1] : vector<8x8xf32> to vector<8xf32>
    %166 = vector.shape_cast %165 : vector<8xf32> to vector<8x1xf32>
    %167 = vector.broadcast %166 : vector<8x1xf32> to vector<8x8xf32>
    %168 = arith.subf %164, %167 : vector<8x8xf32>
    %169 = math.exp %168 : vector<8x8xf32>
    %cst_76 = arith.constant dense<0.000000e+00> : vector<8xf32>
    %170 = vector.multi_reduction <add>, %169, %cst_76 [1] : vector<8x8xf32> to vector<8xf32>
    %171 = vector.shape_cast %170 : vector<8xf32> to vector<8x1xf32>
    %172 = tpu.reciprocal %171 {approx = true} : vector<8x1xf32> -> vector<8x1xf32>
    %173 = vector.broadcast %172 : vector<8x1xf32> to vector<8x8xf32>
    %174 = arith.mulf %169, %173 : vector<8x8xf32>
    %175 = arith.truncf %174 : vector<8x8xf32> to vector<8x8xbf16>
    %cst_77 = arith.constant dense<0.000000e+00> : vector<8x8xf32>
    %176 = tpu.matmul %175, %159, %cst_77 {dimension_numbers = #tpu.dot_dimension_numbers<[1], [0], [0], [1], [0, 0, 1, 1], [], []>} : vector<8x8xbf16>, vector<8x8xbf16>, vector<8x8xf32> -> vector<8x8xf32>
    %c0_78 = arith.constant 0 : index
    %c0_79 = arith.constant 0 : index
    %177 = vector.load %arg26[%c0_78, %c0_79] : memref<8x32xf32, #tpu.memory_space<vmem>>, vector<8x8xf32>
    tpu.vector_store %arg26[%c0_78, %c0_79], %176 {strides = array<i32>} : memref<8x32xf32, #tpu.memory_space<vmem>>, vector<8x8xf32>,
    %178 = vector.extract_strided_slice %154 {offsets = [0, 8], sizes = [8, 8], strides = [1, 1]} : vector<8x32xbf16> to vector<8x8xbf16>
    %179 = vector.extract_strided_slice %155 {offsets = [0, 8], sizes = [8, 8], strides = [1, 1]} : vector<8x32xbf16> to vector<8x8xbf16>
    %180 = vector.extract_strided_slice %156 {offsets = [0, 8], sizes = [8, 8], strides = [1, 1]} : vector<8x32xbf16> to vector<8x8xbf16>
    %cst_80 = arith.constant dense<0.000000e+00> : vector<8x8xf32>
    %181 = tpu.matmul %178, %179, %cst_80 {dimension_numbers = #tpu.dot_dimension_numbers<[1], [1], [0], [0], [0, 0, 1, 0], [], []>} : vector<8x8xbf16>, vector<8x8xbf16>, vector<8x8xf32> -> vector<8x8xf32>
    %cst_81 = arith.constant 0.000000e+00 : f32
    %182 = vector.broadcast %cst_81 : f32 to vector<8x8xf32>
    %183 = arith.cmpf ogt, %8, %182 : vector<8x8xf32>
    %cst_82 = arith.constant -1.000000e+09 : f32
    %184 = vector.broadcast %cst_82 : f32 to vector<8x8xf32>
    %185 = arith.select %183, %181, %184 : vector<8x8xi1>, vector<8x8xf32>
    %cst_83 = arith.constant dense<0xFF800000> : vector<8xf32>
    %186 = vector.multi_reduction <maximumf>, %185, %cst_83 [1] : vector<8x8xf32> to vector<8xf32>
    %187 = vector.shape_cast %186 : vector<8xf32> to vector<8x1xf32>
    %188 = vector.broadcast %187 : vector<8x1xf32> to vector<8x8xf32>
    %189 = arith.subf %185, %188 : vector<8x8xf32>
    %190 = math.exp %189 : vector<8x8xf32>
    %cst_84 = arith.constant dense<0.000000e+00> : vector<8xf32>
    %191 = vector.multi_reduction <add>, %190, %cst_84 [1] : vector<8x8xf32> to vector<8xf32>
    %192 = vector.shape_cast %191 : vector<8xf32> to vector<8x1xf32>
    %193 = tpu.reciprocal %192 {approx = true} : vector<8x1xf32> -> vector<8x1xf32>
    %194 = vector.broadcast %193 : vector<8x1xf32> to vector<8x8xf32>
    %195 = arith.mulf %190, %194 : vector<8x8xf32>
    %196 = arith.truncf %195 : vector<8x8xf32> to vector<8x8xbf16>
    %cst_85 = arith.constant dense<0.000000e+00> : vector<8x8xf32>
    %197 = tpu.matmul %196, %180, %cst_85 {dimension_numbers = #tpu.dot_dimension_numbers<[1], [0], [0], [1], [0, 0, 1, 1], [], []>} : vector<8x8xbf16>, vector<8x8xbf16>, vector<8x8xf32> -> vector<8x8xf32>
    %c0_86 = arith.constant 0 : index
    %c8_87 = arith.constant 8 : index
    %198 = vector.load %arg26[%c0_86, %c8_87] : memref<8x32xf32, #tpu.memory_space<vmem>>, vector<8x8xf32>
    tpu.vector_store %arg26[%c0_86, %c8_87], %197 {strides = array<i32>} : memref<8x32xf32, #tpu.memory_space<vmem>>, vector<8x8xf32>,
    %199 = vector.extract_strided_slice %154 {offsets = [0, 16], sizes = [8, 8], strides = [1, 1]} : vector<8x32xbf16> to vector<8x8xbf16>
    %200 = vector.extract_strided_slice %155 {offsets = [0, 16], sizes = [8, 8], strides = [1, 1]} : vector<8x32xbf16> to vector<8x8xbf16>
    %201 = vector.extract_strided_slice %156 {offsets = [0, 16], sizes = [8, 8], strides = [1, 1]} : vector<8x32xbf16> to vector<8x8xbf16>
    %cst_88 = arith.constant dense<0.000000e+00> : vector<8x8xf32>
    %202 = tpu.matmul %199, %200, %cst_88 {dimension_numbers = #tpu.dot_dimension_numbers<[1], [1], [0], [0], [0, 0, 1, 0], [], []>} : vector<8x8xbf16>, vector<8x8xbf16>, vector<8x8xf32> -> vector<8x8xf32>
    %cst_89 = arith.constant 0.000000e+00 : f32
    %203 = vector.broadcast %cst_89 : f32 to vector<8x8xf32>
    %204 = arith.cmpf ogt, %8, %203 : vector<8x8xf32>
    %cst_90 = arith.constant -1.000000e+09 : f32
    %205 = vector.broadcast %cst_90 : f32 to vector<8x8xf32>
    %206 = arith.select %204, %202, %205 : vector<8x8xi1>, vector<8x8xf32>
    %cst_91 = arith.constant dense<0xFF800000> : vector<8xf32>
    %207 = vector.multi_reduction <maximumf>, %206, %cst_91 [1] : vector<8x8xf32> to vector<8xf32>
    %208 = vector.shape_cast %207 : vector<8xf32> to vector<8x1xf32>
    %209 = vector.broadcast %208 : vector<8x1xf32> to vector<8x8xf32>
    %210 = arith.subf %206, %209 : vector<8x8xf32>
    %211 = math.exp %210 : vector<8x8xf32>
    %cst_92 = arith.constant dense<0.000000e+00> : vector<8xf32>
    %212 = vector.multi_reduction <add>, %211, %cst_92 [1] : vector<8x8xf32> to vector<8xf32>
    %213 = vector.shape_cast %212 : vector<8xf32> to vector<8x1xf32>
    %214 = tpu.reciprocal %213 {approx = true} : vector<8x1xf32> -> vector<8x1xf32>
    %215 = vector.broadcast %214 : vector<8x1xf32> to vector<8x8xf32>
    %216 = arith.mulf %211, %215 : vector<8x8xf32>
    %217 = arith.truncf %216 : vector<8x8xf32> to vector<8x8xbf16>
    %cst_93 = arith.constant dense<0.000000e+00> : vector<8x8xf32>
    %218 = tpu.matmul %217, %201, %cst_93 {dimension_numbers = #tpu.dot_dimension_numbers<[1], [0], [0], [1], [0, 0, 1, 1], [], []>} : vector<8x8xbf16>, vector<8x8xbf16>, vector<8x8xf32> -> vector<8x8xf32>
    %c0_94 = arith.constant 0 : index
    %c16_95 = arith.constant 16 : index
    %219 = vector.load %arg26[%c0_94, %c16_95] : memref<8x32xf32, #tpu.memory_space<vmem>>, vector<8x8xf32>
    tpu.vector_store %arg26[%c0_94, %c16_95], %218 {strides = array<i32>} : memref<8x32xf32, #tpu.memory_space<vmem>>, vector<8x8xf32>,
    %220 = vector.extract_strided_slice %154 {offsets = [0, 24], sizes = [8, 8], strides = [1, 1]} : vector<8x32xbf16> to vector<8x8xbf16>
    %221 = vector.extract_strided_slice %155 {offsets = [0, 24], sizes = [8, 8], strides = [1, 1]} : vector<8x32xbf16> to vector<8x8xbf16>
    %222 = vector.extract_strided_slice %156 {offsets = [0, 24], sizes = [8, 8], strides = [1, 1]} : vector<8x32xbf16> to vector<8x8xbf16>
    %cst_96 = arith.constant dense<0.000000e+00> : vector<8x8xf32>
    %223 = tpu.matmul %220, %221, %cst_96 {dimension_numbers = #tpu.dot_dimension_numbers<[1], [1], [0], [0], [0, 0, 1, 0], [], []>} : vector<8x8xbf16>, vector<8x8xbf16>, vector<8x8xf32> -> vector<8x8xf32>
    %cst_97 = arith.constant 0.000000e+00 : f32
    %224 = vector.broadcast %cst_97 : f32 to vector<8x8xf32>
    %225 = arith.cmpf ogt, %8, %224 : vector<8x8xf32>
    %cst_98 = arith.constant -1.000000e+09 : f32
    %226 = vector.broadcast %cst_98 : f32 to vector<8x8xf32>
    %227 = arith.select %225, %223, %226 : vector<8x8xi1>, vector<8x8xf32>
    %cst_99 = arith.constant dense<0xFF800000> : vector<8xf32>
    %228 = vector.multi_reduction <maximumf>, %227, %cst_99 [1] : vector<8x8xf32> to vector<8xf32>
    %229 = vector.shape_cast %228 : vector<8xf32> to vector<8x1xf32>
    %230 = vector.broadcast %229 : vector<8x1xf32> to vector<8x8xf32>
    %231 = arith.subf %227, %230 : vector<8x8xf32>
    %232 = math.exp %231 : vector<8x8xf32>
    %cst_100 = arith.constant dense<0.000000e+00> : vector<8xf32>
    %233 = vector.multi_reduction <add>, %232, %cst_100 [1] : vector<8x8xf32> to vector<8xf32>
    %234 = vector.shape_cast %233 : vector<8xf32> to vector<8x1xf32>
    %235 = tpu.reciprocal %234 {approx = true} : vector<8x1xf32> -> vector<8x1xf32>
    %236 = vector.broadcast %235 : vector<8x1xf32> to vector<8x8xf32>
    %237 = arith.mulf %232, %236 : vector<8x8xf32>
    %238 = arith.truncf %237 : vector<8x8xf32> to vector<8x8xbf16>
    %cst_101 = arith.constant dense<0.000000e+00> : vector<8x8xf32>
    %239 = tpu.matmul %238, %222, %cst_101 {dimension_numbers = #tpu.dot_dimension_numbers<[1], [0], [0], [1], [0, 0, 1, 1], [], []>} : vector<8x8xbf16>, vector<8x8xbf16>, vector<8x8xf32> -> vector<8x8xf32>
    %c0_102 = arith.constant 0 : index
    %c24_103 = arith.constant 24 : index
    %240 = vector.load %arg26[%c0_102, %c24_103] : memref<8x32xf32, #tpu.memory_space<vmem>>, vector<8x8xf32>
    tpu.vector_store %arg26[%c0_102, %c24_103], %239 {strides = array<i32>} : memref<8x32xf32, #tpu.memory_space<vmem>>, vector<8x8xf32>,
    %c0_104 = arith.constant 0 : index
    %c0_105 = arith.constant 0 : index
    %241 = vector.load %arg26[%c0_104, %c0_105] : memref<8x32xf32, #tpu.memory_space<vmem>>, vector<8x32xf32>
    %242 = arith.truncf %241 : vector<8x32xf32> to vector<8x32xbf16>
    %c0_106 = arith.constant 0 : index
    %c0_107 = arith.constant 0 : index
    %243 = vector.load %arg13[%c0_106, %c0_107] : memref<32x32xbf16, #tpu.memory_space<vmem>>, vector<32x32xbf16>
    %cst_108 = arith.constant dense<0.000000e+00> : vector<8x32xf32>
    %244 = tpu.matmul %242, %243, %cst_108 {dimension_numbers = #tpu.dot_dimension_numbers<[1], [0], [0], [1], [0, 0, 1, 1], [], []>} : vector<8x32xbf16>, vector<32x32xbf16>, vector<8x32xf32> -> vector<8x32xf32>
    %c0_109 = arith.constant 0 : index
    %c0_110 = arith.constant 0 : index
    %245 = vector.load %arg14[%c0_109, %c0_110] : memref<1x32xf32, #tpu.memory_space<vmem>>, vector<1x32xf32>
    %246 = vector.broadcast %245 : vector<1x32xf32> to vector<8x32xf32>
    %247 = arith.addf %244, %246 : vector<8x32xf32>
    %248 = arith.addf %138, %247 : vector<8x32xf32>
    %c0_111 = arith.constant 0 : index
    %c0_112 = arith.constant 0 : index
    %249 = vector.load %arg21[%c0_111, %c0_112] : memref<1x32xf32, #tpu.memory_space<vmem>>, vector<1x32xf32>
    %c0_113 = arith.constant 0 : index
    %c0_114 = arith.constant 0 : index
    %250 = vector.load %arg22[%c0_113, %c0_114] : memref<1x32xf32, #tpu.memory_space<vmem>>, vector<1x32xf32>
    %cst_115 = arith.constant dense<0.000000e+00> : vector<8xf32>
    %251 = vector.multi_reduction <add>, %248, %cst_115 [1] : vector<8x32xf32> to vector<8xf32>
    %252 = vector.shape_cast %251 : vector<8xf32> to vector<8x1xf32>
    %cst_116 = arith.constant 3.200000e+01 : f32
    %253 = vector.broadcast %cst_116 : f32 to vector<8x1xf32>
    %254 = arith.divf %252, %253 : vector<8x1xf32>
    %255 = vector.broadcast %254 : vector<8x1xf32> to vector<8x32xf32>
    %256 = arith.subf %248, %255 : vector<8x32xf32>
    %257 = arith.mulf %256, %256 : vector<8x32xf32>
    %cst_117 = arith.constant dense<0.000000e+00> : vector<8xf32>
    %258 = vector.multi_reduction <add>, %257, %cst_117 [1] : vector<8x32xf32> to vector<8xf32>
    %259 = vector.shape_cast %258 : vector<8xf32> to vector<8x1xf32>
    %cst_118 = arith.constant 3.200000e+01 : f32
    %260 = vector.broadcast %cst_118 : f32 to vector<8x1xf32>
    %261 = arith.divf %259, %260 : vector<8x1xf32>
    %262 = vector.broadcast %254 : vector<8x1xf32> to vector<8x32xf32>
    %263 = arith.subf %248, %262 : vector<8x32xf32>
    %cst_119 = arith.constant 9.99999974E-6 : f32
    %264 = vector.broadcast %cst_119 : f32 to vector<8x1xf32>
    %265 = arith.addf %261, %264 : vector<8x1xf32>
    %266 = math.rsqrt %265 : vector<8x1xf32>
    %267 = vector.broadcast %266 : vector<8x1xf32> to vector<8x32xf32>
    %268 = arith.mulf %263, %267 : vector<8x32xf32>
    %269 = vector.broadcast %249 : vector<1x32xf32> to vector<8x32xf32>
    %270 = arith.mulf %268, %269 : vector<8x32xf32>
    %271 = vector.broadcast %250 : vector<1x32xf32> to vector<8x32xf32>
    %272 = arith.addf %270, %271 : vector<8x32xf32>
    %273 = arith.truncf %272 : vector<8x32xf32> to vector<8x32xbf16>
    %c0_120 = arith.constant 0 : index
    %c0_121 = arith.constant 0 : index
    %274 = vector.load %arg15[%c0_120, %c0_121] : memref<32x64xbf16, #tpu.memory_space<vmem>>, vector<32x64xbf16>
    %cst_122 = arith.constant dense<0.000000e+00> : vector<8x64xf32>
    %275 = tpu.matmul %273, %274, %cst_122 {dimension_numbers = #tpu.dot_dimension_numbers<[1], [0], [0], [1], [0, 0, 1, 1], [], []>} : vector<8x32xbf16>, vector<32x64xbf16>, vector<8x64xf32> -> vector<8x64xf32>
    %c0_123 = arith.constant 0 : index
    %c0_124 = arith.constant 0 : index
    %276 = vector.load %arg16[%c0_123, %c0_124] : memref<1x64xf32, #tpu.memory_space<vmem>>, vector<1x64xf32>
    %277 = vector.broadcast %276 : vector<1x64xf32> to vector<8x64xf32>
    %278 = arith.addf %275, %277 : vector<8x64xf32>
    %cst_125 = arith.constant 0.000000e+00 : f32
    %279 = vector.broadcast %cst_125 : f32 to vector<8x64xf32>
    %280 = arith.maximumf %278, %279 : vector<8x64xf32>
    %281 = arith.truncf %280 : vector<8x64xf32> to vector<8x64xbf16>
    %c0_126 = arith.constant 0 : index
    %c0_127 = arith.constant 0 : index
    %282 = vector.load %arg17[%c0_126, %c0_127] : memref<64x32xbf16, #tpu.memory_space<vmem>>, vector<64x32xbf16>
    %cst_128 = arith.constant dense<0.000000e+00> : vector<8x32xf32>
    %283 = tpu.matmul %281, %282, %cst_128 {dimension_numbers = #tpu.dot_dimension_numbers<[1], [0], [0], [1], [0, 0, 1, 1], [], []>} : vector<8x64xbf16>, vector<64x32xbf16>, vector<8x32xf32> -> vector<8x32xf32>
    %c0_129 = arith.constant 0 : index
    %c0_130 = arith.constant 0 : index
    %284 = vector.load %arg18[%c0_129, %c0_130] : memref<1x32xf32, #tpu.memory_space<vmem>>, vector<1x32xf32>
    %285 = vector.broadcast %284 : vector<1x32xf32> to vector<8x32xf32>
    %286 = arith.addf %283, %285 : vector<8x32xf32>
    %287 = arith.addf %272, %286 : vector<8x32xf32>
    %c0_131 = arith.constant 0 : index
    %c0_132 = arith.constant 0 : index
    %288 = vector.load %arg23[%c0_131, %c0_132] : memref<1x32xf32, #tpu.memory_space<vmem>>, vector<1x32xf32>
    %c0_133 = arith.constant 0 : index
    %c0_134 = arith.constant 0 : index
    %289 = vector.load %arg24[%c0_133, %c0_134] : memref<1x32xf32, #tpu.memory_space<vmem>>, vector<1x32xf32>
    %cst_135 = arith.constant dense<0.000000e+00> : vector<8xf32>
    %290 = vector.multi_reduction <add>, %287, %cst_135 [1] : vector<8x32xf32> to vector<8xf32>
    %291 = vector.shape_cast %290 : vector<8xf32> to vector<8x1xf32>
    %cst_136 = arith.constant 3.200000e+01 : f32
    %292 = vector.broadcast %cst_136 : f32 to vector<8x1xf32>
    %293 = arith.divf %291, %292 : vector<8x1xf32>
    %294 = vector.broadcast %293 : vector<8x1xf32> to vector<8x32xf32>
    %295 = arith.subf %287, %294 : vector<8x32xf32>
    %296 = arith.mulf %295, %295 : vector<8x32xf32>
    %cst_137 = arith.constant dense<0.000000e+00> : vector<8xf32>
    %297 = vector.multi_reduction <add>, %296, %cst_137 [1] : vector<8x32xf32> to vector<8xf32>
    %298 = vector.shape_cast %297 : vector<8xf32> to vector<8x1xf32>
    %cst_138 = arith.constant 3.200000e+01 : f32
    %299 = vector.broadcast %cst_138 : f32 to vector<8x1xf32>
    %300 = arith.divf %298, %299 : vector<8x1xf32>
    %301 = vector.broadcast %293 : vector<8x1xf32> to vector<8x32xf32>
    %302 = arith.subf %287, %301 : vector<8x32xf32>
    %cst_139 = arith.constant 9.99999974E-6 : f32
    %303 = vector.broadcast %cst_139 : f32 to vector<8x1xf32>
    %304 = arith.addf %300, %303 : vector<8x1xf32>
    %305 = math.rsqrt %304 : vector<8x1xf32>
    %306 = vector.broadcast %305 : vector<8x1xf32> to vector<8x32xf32>
    %307 = arith.mulf %302, %306 : vector<8x32xf32>
    %308 = vector.broadcast %288 : vector<1x32xf32> to vector<8x32xf32>
    %309 = arith.mulf %307, %308 : vector<8x32xf32>
    %310 = vector.broadcast %289 : vector<1x32xf32> to vector<8x32xf32>
    %311 = arith.addf %309, %310 : vector<8x32xf32>
    %c0_140 = arith.constant 0 : index
    %c0_141 = arith.constant 0 : index
    %c0_142 = arith.constant 0 : index
    %312 = vector.load %arg25[%c0_140, %c0_141, %c0_142] : memref<1x8x32xf32, #tpu.memory_space<vmem>>, vector<1x8x32xf32>
    %313 = vector.shape_cast %312 : vector<1x8x32xf32> to vector<8x32xf32>
    %314 = vector.shape_cast %311 : vector<8x32xf32> to vector<1x8x32xf32>
    tpu.vector_store %arg25[%c0_140, %c0_141, %c0_142], %314 {strides = array<i32>} : memref<1x8x32xf32, #tpu.memory_space<vmem>>, vector<1x8x32xf32>,
    return
  }
  func.func @transform_0(%arg0: i32) -> (i32, i32, i32) {
    %c0_i32 = arith.constant 0 : i32
    %c0_i32_0 = arith.constant 0 : i32
    %c0_i32_1 = arith.constant 0 : i32
    return %arg0, %c0_i32, %c0_i32_0 : i32, i32, i32
  }
  func.func @transform_1(%arg0: i32) -> (i32, i32, i32) {
    %c0_i32 = arith.constant 0 : i32
    %c0_i32_0 = arith.constant 0 : i32
    %c0_i32_1 = arith.constant 0 : i32
    return %arg0, %c0_i32, %c0_i32_0 : i32, i32, i32
  }
  func.func @transform_2(%arg0: i32) -> (i32, i32, i32) {
    %c0_i32 = arith.constant 0 : i32
    %c0_i32_0 = arith.constant 0 : i32
    %c0_i32_1 = arith.constant 0 : i32
    return %arg0, %c0_i32, %c0_i32_0 : i32, i32, i32
  }
  func.func @transform_3(%arg0: i32) -> (i32, i32, i32) {
    %c0_i32 = arith.constant 0 : i32
    %c0_i32_0 = arith.constant 0 : i32
    %c0_i32_1 = arith.constant 0 : i32
    return %arg0, %c0_i32, %c0_i32_0 : i32, i32, i32
  }
  func.func @transform_4(%arg0: i32) -> (i32, i32) {
    %c0_i32 = arith.constant 0 : i32
    %c0_i32_0 = arith.constant 0 : i32
    %c0_i32_1 = arith.constant 0 : i32
    return %c0_i32, %c0_i32_0 : i32, i32
  }
  func.func @transform_5(%arg0: i32) -> (i32, i32) {
    %c0_i32 = arith.constant 0 : i32
    %c0_i32_0 = arith.constant 0 : i32
    %c0_i32_1 = arith.constant 0 : i32
    return %c0_i32, %c0_i32_0 : i32, i32
  }
  func.func @transform_6(%arg0: i32) -> (i32, i32) {
    %c0_i32 = arith.constant 0 : i32
    %c0_i32_0 = arith.constant 0 : i32
    %c0_i32_1 = arith.constant 0 : i32
    return %c0_i32, %c0_i32_0 : i32, i32
  }
  func.func @transform_7(%arg0: i32) -> (i32, i32) {
    %c0_i32 = arith.constant 0 : i32
    %c0_i32_0 = arith.constant 0 : i32
    %c0_i32_1 = arith.constant 0 : i32
    return %c0_i32, %c0_i32_0 : i32, i32
  }
  func.func @transform_8(%arg0: i32) -> (i32, i32) {
    %c0_i32 = arith.constant 0 : i32
    %c0_i32_0 = arith.constant 0 : i32
    %c0_i32_1 = arith.constant 0 : i32
    return %c0_i32, %c0_i32_0 : i32, i32
  }
  func.func @transform_9(%arg0: i32) -> (i32, i32) {
    %c0_i32 = arith.constant 0 : i32
    %c0_i32_0 = arith.constant 0 : i32
    %c0_i32_1 = arith.constant 0 : i32
    return %c0_i32, %c0_i32_0 : i32, i32
  }
  func.func @transform_10(%arg0: i32) -> (i32, i32) {
    %c0_i32 = arith.constant 0 : i32
    %c0_i32_0 = arith.constant 0 : i32
    %c0_i32_1 = arith.constant 0 : i32
    return %c0_i32, %c0_i32_0 : i32, i32
  }
  func.func @transform_11(%arg0: i32) -> (i32, i32) {
    %c0_i32 = arith.constant 0 : i32
    %c0_i32_0 = arith.constant 0 : i32
    %c0_i32_1 = arith.constant 0 : i32
    return %c0_i32, %c0_i32_0 : i32, i32
  }
  func.func @transform_12(%arg0: i32) -> (i32, i32) {
    %c0_i32 = arith.constant 0 : i32
    %c0_i32_0 = arith.constant 0 : i32
    %c0_i32_1 = arith.constant 0 : i32
    return %c0_i32, %c0_i32_0 : i32, i32
  }
  func.func @transform_13(%arg0: i32) -> (i32, i32) {
    %c0_i32 = arith.constant 0 : i32
    %c0_i32_0 = arith.constant 0 : i32
    %c0_i32_1 = arith.constant 0 : i32
    return %c0_i32, %c0_i32_0 : i32, i32
  }
  func.func @transform_14(%arg0: i32) -> (i32, i32) {
    %c0_i32 = arith.constant 0 : i32
    %c0_i32_0 = arith.constant 0 : i32
    %c0_i32_1 = arith.constant 0 : i32
    return %c0_i32, %c0_i32_0 : i32, i32
  }
  func.func @transform_15(%arg0: i32) -> (i32, i32) {
    %c0_i32 = arith.constant 0 : i32
    %c0_i32_0 = arith.constant 0 : i32
    %c0_i32_1 = arith.constant 0 : i32
    return %c0_i32, %c0_i32_0 : i32, i32
  }
  func.func @transform_16(%arg0: i32) -> (i32, i32) {
    %c0_i32 = arith.constant 0 : i32
    %c0_i32_0 = arith.constant 0 : i32
    %c0_i32_1 = arith.constant 0 : i32
    return %c0_i32, %c0_i32_0 : i32, i32
  }
  func.func @transform_17(%arg0: i32) -> (i32, i32) {
    %c0_i32 = arith.constant 0 : i32
    %c0_i32_0 = arith.constant 0 : i32
    %c0_i32_1 = arith.constant 0 : i32
    return %c0_i32, %c0_i32_0 : i32, i32
  }
  func.func @transform_18(%arg0: i32) -> (i32, i32) {
    %c0_i32 = arith.constant 0 : i32
    %c0_i32_0 = arith.constant 0 : i32
    %c0_i32_1 = arith.constant 0 : i32
    return %c0_i32, %c0_i32_0 : i32, i32
  }
  func.func @transform_19(%arg0: i32) -> (i32, i32) {
    %c0_i32 = arith.constant 0 : i32
    %c0_i32_0 = arith.constant 0 : i32
    %c0_i32_1 = arith.constant 0 : i32
    return %c0_i32, %c0_i32_0 : i32, i32
  }
  func.func @transform_20(%arg0: i32) -> (i32, i32) {
    %c0_i32 = arith.constant 0 : i32
    %c0_i32_0 = arith.constant 0 : i32
    %c0_i32_1 = arith.constant 0 : i32
    return %c0_i32, %c0_i32_0 : i32, i32
  }
  func.func @transform_21(%arg0: i32) -> (i32, i32) {
    %c0_i32 = arith.constant 0 : i32
    %c0_i32_0 = arith.constant 0 : i32
    %c0_i32_1 = arith.constant 0 : i32
    return %c0_i32, %c0_i32_0 : i32, i32
  }
  func.func @transform_22(%arg0: i32) -> (i32, i32) {
    %c0_i32 = arith.constant 0 : i32
    %c0_i32_0 = arith.constant 0 : i32
    %c0_i32_1 = arith.constant 0 : i32
    return %c0_i32, %c0_i32_0 : i32, i32
  }
  func.func @transform_23(%arg0: i32) -> (i32, i32) {
    %c0_i32 = arith.constant 0 : i32
    %c0_i32_0 = arith.constant 0 : i32
    %c0_i32_1 = arith.constant 0 : i32
    return %c0_i32, %c0_i32_0 : i32, i32
  }
  func.func @transform_24(%arg0: i32) -> (i32, i32, i32) {
    %c0_i32 = arith.constant 0 : i32
    %c0_i32_0 = arith.constant 0 : i32
    %c0_i32_1 = arith.constant 0 : i32
    return %arg0, %c0_i32, %c0_i32_0 : i32, i32, i32
  }
}

</mosaic_0001>

<bundles_post_ra>
// kernel: tpu_custom_call.1
= control target key start
LH: loop header
LB: loop body
LE: loop exit
PB: predicated region body
PF: predicated region fallthrough
CT: control target
= control target key end

     0   :  { %s4266_s0 = inlined_call_operand.vmem [shape: f32[2,8,32], index: 0, kind: input, shape index: {}]   ;;  %s4267_s1 = inlined_call_operand.vmem [shape: f32[2,8,32], index: 1, kind: input, shape index: {}]   ;;  %s4268_s2 = inlined_call_operand.vmem [shape: f32[2,8,8], index: 2, kind: input, shape index: {}]   ;;  %s4269_s3 = inlined_call_operand.hbm [shape: f32[2,8,8], index: 3, kind: input, shape index: {}]   ;;  %s4270_s4 = inlined_call_operand.hbm [shape: bf16[32,96], index: 4, kind: input, shape index: {}]   ;;  %s4271_s5 = inlined_call_operand.vmem [shape: f32[1,96], index: 5, kind: input, shape index: {}]   ;;  %s4272_s6 = inlined_call_operand.hbm [shape: bf16[32,32], index: 6, kind: input, shape index: {}]   ;;  %s4273_s7 = inlined_call_operand.hbm [shape: f32[1,32], index: 7, kind: input, shape index: {}]   ;;  %s4274_s8 = inlined_call_operand.hbm [shape: bf16[32,32], index: 8, kind: input, shape index: {}]   ;;  %s4275_s9 = inlined_call_operand.hbm [shape: f32[1,32], index: 9, kind: input, shape index: {}]   ;;  %s4276_s10 = inlined_call_operand.vmem [shape: bf16[32,64], index: 10, kind: input, shape index: {}]   ;;  %s4277_s11 = inlined_call_operand.hbm [shape: f32[1,64], index: 11, kind: input, shape index: {}]   ;;  %s4278_s12 = inlined_call_operand.hbm [shape: bf16[32,32], index: 12, kind: input, shape index: {}]   ;;  %s4279_s13 = inlined_call_operand.hbm [shape: f32[1,32], index: 13, kind: input, shape index: {}]   ;;  %s4280_s14 = inlined_call_operand.vmem [shape: bf16[32,64], index: 14, kind: input, shape index: {}]   ;;  %s4281_s15 = inlined_call_operand.vmem [shape: f32[1,64], index: 15, kind: input, shape index: {}]   ;;  %s4282_s16 = inlined_call_operand.vmem [shape: bf16[64,32], index: 16, kind: input, shape index: {}]   ;;  %s4283_s17 = inlined_call_operand.vmem [shape: f32[1,32], index: 17, kind: input, shape index: {}]   ;;  %s4284_s18 = inlined_call_operand.vmem [shape: f32[1,32], index: 18, kind: input, shape index: {}]   ;;  %s4285_s19 = inlined_call_operand.vmem [shape: f32[1,32], index: 19, kind: input, shape index: {}]   ;;  %s4286_s20 = inlined_call_operand.vmem [shape: f32[1,32], index: 20, kind: input, shape index: {}]   ;;  %s4287_s21 = inlined_call_operand.vmem [shape: f32[1,32], index: 21, kind: input, shape index: {}]   ;;  %s4288_s22 = inlined_call_operand.vmem [shape: f32[1,32], index: 22, kind: input, shape index: {}]   ;;  %s4289_s23 = inlined_call_operand.vmem [shape: f32[1,32], index: 23, kind: input, shape index: {}]   ;;  %s4290_s24 = inlined_call_operand.hbm [shape: f32[2,8,32], index: 24, kind: output, shape index: {}]  }
   0x1   :  { %4315 = sst [smem:[#allocation25_spill]] %s4266_s0 }
   0x2   :  { %4316 = sst [smem:[#allocation26_spill]] %s4267_s1 }
   0x3   :  { %4317 = sst [smem:[#allocation27_spill]] %s4268_s2 }
   0x4   :  { %4318 = sst [smem:[#allocation28_spill]] %s4269_s3 }
   0x5   :  { %4319 = sst [smem:[#allocation29_spill]] %s4270_s4 }
   0x6   :  { %4320 = sst [smem:[#allocation30_spill]] %s4271_s5 }
   0x7   :  { %4321 = sst [smem:[#allocation31_spill]] %s4272_s6 }
   0x8   :  { %4322 = sst [smem:[#allocation32_spill]] %s4273_s7 }
   0x9   :  { %4323 = sst [smem:[#allocation33_spill]] %s4274_s8 }
   0xa   :  { %4324 = sst [smem:[#allocation34_spill]] %s4275_s9 }
   0xb   :  { %4325 = sst [smem:[#allocation35_spill]] %s4276_s10 }
   0xc   :  { %4326 = sst [smem:[#allocation36_spill]] %s4277_s11 }
   0xd   :  { %4327 = sst [smem:[#allocation37_spill]] %s4278_s12 }
   0xe   :  { %4328 = sst [smem:[#allocation38_spill]] %s4280_s14 }
   0xf   :  { %4329 = sst [smem:[#allocation39_spill]] %s4281_s15 }
  0x10   :  { %4330 = sst [smem:[#allocation40_spill]] %s4282_s16 }
  0x11   :  { %4331 = sst [smem:[#allocation41_spill]] %s4283_s17 }
  0x12   :  { %4332 = sst [smem:[#allocation42_spill]] %s4286_s20 }
  0x13   :  { %4333 = sst [smem:[#allocation43_spill]] %s4287_s21 }
  0x14   :  { %4334 = sst [smem:[#allocation44_spill]] %s4288_s22 }
  0x15   :  { %4335 = sst [smem:[#allocation45_spill]] %s4289_s23 }
  0x16   :  { %4336 = sst [smem:[#allocation46_spill]] %s4290_s24 }
  0x17   :  { %29 = vsyncpa [#allocation4], 0 }
  0x18   :  { %31 = vsyncpa [#allocation4 + $0x1], 0 }
  0x19   :  { %32 = vsyncpa [#allocation7], 0 }
  0x1a   :  { %33 = vsyncpa [#allocation10], 0 }
  0x1b   :  { %34 = vsyncpa [#allocation13], 0 }
  0x1c   :  { %35 = vsyncpa [#allocation16], 0 }
  0x1d   :  { %36 = vsyncpa [#allocation5], 0 }
  0x1e   :  { %38 = vsyncpa [#allocation5 + $0x1], 0  ;;  %s3610_s5 = smov 0   ;;  %s3612_s26 = smov 0  }
  0x1f   :  { %s3614_s27 = smov 0   ;;  %s3616_s28 = smov 0  }
  0x20 LB: > { %s3457_s6 = smov [#allocation6]   ;;  %s3631_s29 = sadd.s32 4294967295, %s3455_s28   ;;  %s3455_s28 = sphi %s3616_s28, %s4392_s28   ;;  %s3451_s27 = sphi %s3614_s27, %s4391_s27   ;;  %s3447_s26 = sphi %s3612_s26, %s4390_s26   ;;  %s3443_s5 = sphi %s3610_s5, %s4389_s5  }
  0x21   : > { %s611_s2 = sshll.u32 %s3457_s6, 4  ;;  %p2627_p0 = scmp.ge.s32.totalorder %s3455_s28, 1  ;;  %s3636_s2 = int_to_ptr.vmem [resolvable:$true] %s611_s2 }
  0x22   : > { %p4301_p1 = scmp.eq.s32.totalorder %s3631_s29, 0  ;;  %p599_p2 = scmp.lt.s32.totalorder %s3455_s28, 3 }
  0x23   : > { %s3458_s7 = smov [#allocation9]   ;;  %s3459_s25 = smov [#allocation12]  }
  0x24   : > { %p3638_p3 = pnand %p2627_p0, %p599_p2  ;;  %s641_s30 = sshll.u32 %s3458_s7, 4  ;;  %s3651_s30 = int_to_ptr.vmem [resolvable:$true] %s641_s30 }
  0x25   : > { %s665_s8 = sshll.u32 %s3459_s25, 4  ;;  %s4339_s6 = sld [smem:[#allocation29_spill]]  ;;  %s3653_s8 = int_to_ptr.vmem [resolvable:$true] %s665_s8 }
  0x26   : > { %s4337_s0 = scalar_select %p3638_p3, 1, 0 }
  0x27   : > { %p2956_p5 = pneg %p3638_p3 }
  0x29   : > { %p3647_p6 = pnand %p2956_p5, %p4301_p1 }
  0x2b   : > { %s3119_s24 = scalar_lea.hbm %s4339_s6, 256  ;;  %p3663_p8 = pneg %p3647_p6 }
  0x2c   : > { %p3120_p7 = scmp.ne.s32.totalorder %s4339_s6, %s3119_s24  ;;  %p3126_p11 = scmp.lt.u32.totalorder %s3119_s24, %s4339_s6 }
  0x2e   : > { %p3122_p9 = pnand %p3663_p8, %p3120_p7 }
  0x30   : > { %p3123_p10 = pneg %p3122_p9 }
  0x32   : > { %p3128_p12 = pnand %p3126_p11, %p3123_p10 }
  0x34   : > { %3131 = shalt.err (!%p3128_p12)
}
  0x35   : > { %s3132_s22 = scalar_lea.vmem %s3636_s2, 256  ;;  %p3140_p5 = scmp.lt.s32.totalorder %s3636_s2, %s3636_s2 }
  0x36   : > { %p3133_p13 = scmp.ne.s32.totalorder %s3636_s2, %s3132_s22  ;;  %p3141_p4 = scmp.lt.s32.totalorder %s3132_s22, %s3132_s22 }
  0x38   : > { %p3135_p0 = pnand %p3133_p13, %p3663_p8  ;;  %p3142_p7 = por %p3141_p4, %p3140_p5 }
  0x3a   : > { %p3136_p2 = pneg %p3135_p0 }
  0x3c   : > { %p3143_p9 = pnand %p3142_p7, %p3136_p2 }
  0x3e   : > { %3146 = shalt.err (!%p3143_p9)
}
  0x3f   : > { %s4299_s23 = smov 64   ;;  %s3461_s17 = smov 4  }
  0x40   : > { %2959 = dma.hbm_to_vmem [thread:$0]  (!%p3647_p6), %s4339_s6, 256, %s3636_s2, [#allocation7], %s4299_s23, %s4299_s23, %s3461_s17  }
  0x41   : > { %s4341_s15 = sld [smem:[#allocation32_spill]] }
  0x47   : > { %s3147_s22 = scalar_lea.hbm %s4341_s15, 16 }
  0x48   : > { %p3148_p4 = scmp.ne.s32.totalorder %s4341_s15, %s3147_s22  ;;  %p3154_p12 = scmp.lt.u32.totalorder %s3147_s22, %s4341_s15 }
  0x4a   : > { %p3150_p10 = pnand %p3148_p4, %p3663_p8 }
  0x4c   : > { %p3151_p11 = pneg %p3150_p10 }
  0x4e   : > { %p3156_p13 = pnand %p3154_p12, %p3151_p11 }
  0x50   : > { %3159 = shalt.err (!%p3156_p13)
}
  0x51   : > { %s3160_s2 = scalar_lea.vmem %s3651_s30, 16  ;;  %s3167_s20 = scalar_lea.vmem %s3651_s30, 32 }
  0x52   : > { %p3161_p0 = scmp.ne.s32.totalorder %s3651_s30, %s3160_s2  ;;  %p3168_p7 = scmp.lt.s32.totalorder %s3651_s30, %s3651_s30 }
  0x53   : > { %p3169_p9 = scmp.lt.s32.totalorder %s3167_s20, %s3160_s2 }
  0x54   : > { %p3163_p2 = pnand %p3161_p0, %p3663_p8 }
  0x55   : > { %p3170_p4 = por %p3169_p9, %p3168_p7 }
  0x56   : > { %p3164_p5 = pneg %p3163_p2 }
  0x58   : > { %p3171_p10 = pnand %p3170_p4, %p3164_p5 }
  0x5a   : > { %3174 = shalt.err (!%p3171_p10)
}
  0x5b   : > { %2965 = dma.hbm_to_vmem [thread:$0]  (!%p3647_p6), %s4341_s15, 16, %s3651_s30, [#allocation10]  }
  0x5c   : > { %s4342_s9 = sld [smem:[#allocation34_spill]] }
  0x62   : > { %s3175_s4 = scalar_lea.hbm %s4342_s9, 16 }
  0x63   : > { %p3176_p11 = scmp.ne.s32.totalorder %s4342_s9, %s3175_s4  ;;  %p3182_p0 = scmp.lt.u32.totalorder %s3175_s4, %s4342_s9 }
  0x65   : > { %p3178_p12 = pnand %p3176_p11, %p3663_p8 }
  0x67   : > { %p3179_p13 = pneg %p3178_p12 }
  0x69   : > { %p3184_p2 = pnand %p3182_p0, %p3179_p13 }
  0x6b   : > { %3187 = shalt.err (!%p3184_p2)
}
  0x6c   : > { %s3188_s30 = scalar_lea.vmem %s3653_s8, 16  ;;  %s3195_s20 = scalar_lea.vmem %s3653_s8, 32 }
  0x6d   : > { %p3189_p5 = scmp.ne.s32.totalorder %s3653_s8, %s3188_s30  ;;  %p3196_p4 = scmp.lt.s32.totalorder %s3653_s8, %s3653_s8 }
  0x6e   : > { %p3197_p10 = scmp.lt.s32.totalorder %s3195_s20, %s3188_s30 }
  0x6f   : > { %p3191_p7 = pnand %p3189_p5, %p3663_p8 }
  0x70   : > { %p3198_p11 = por %p3197_p10, %p3196_p4 }
  0x71   : > { %p3192_p9 = pneg %p3191_p7 }
  0x73   : > { %p3199_p12 = pnand %p3198_p11, %p3192_p9 }
  0x75   : > { %3202 = shalt.err (!%p3199_p12)
}
  0x76   : > { %2971 = dma.hbm_to_vmem [thread:$0]  (!%p3647_p6), %s4342_s9, 16, %s3653_s8, [#allocation13]  }
  0x77   : > { %s3462_s21 = smov [#allocation15]   ;;  %s3463_s4 = smov [#allocation8]  }
  0x78   : > { %s689_s24 = sshll.u32 %s3462_s21, 4  ;;  %s627_s1 = sshll.u32 %s3463_s4, 4  ;;  %s690_s24 = int_to_ptr.vmem [resolvable:$true] %s689_s24  ;;  %s628_s1 = int_to_ptr.vmem [resolvable:$true] %s627_s1 }
  0x79   : > { %s4343_s12 = sld [smem:[#allocation37_spill]] }
  0x7f   : > { %s3203_s2 = scalar_lea.hbm %s4343_s12, 256 }
  0x80   : > { %p3204_p13 = scmp.ne.s32.totalorder %s4343_s12, %s3203_s2  ;;  %p3210_p5 = scmp.lt.u32.totalorder %s3203_s2, %s4343_s12 }
  0x82   : > { %p3206_p0 = pnand %p3204_p13, %p3663_p8 }
  0x84   : > { %p3207_p2 = pneg %p3206_p0 }
  0x86   : > { %p3212_p7 = pnand %p3210_p5, %p3207_p2 }
  0x88   : > { %3215 = shalt.err (!%p3212_p7)
}
  0x89   : > { %s3216_s8 = scalar_lea.vmem %s690_s24, 256  ;;  %p3224_p11 = scmp.lt.s32.totalorder %s690_s24, %s690_s24 }
  0x8a   : > { %p3217_p9 = scmp.ne.s32.totalorder %s690_s24, %s3216_s8  ;;  %p3225_p12 = scmp.lt.s32.totalorder %s3216_s8, %s3216_s8 }
  0x8c   : > { %p3219_p4 = pnand %p3217_p9, %p3663_p8  ;;  %p3226_p1 = por %p3225_p12, %p3224_p11 }
  0x8e   : > { %p3220_p10 = pneg %p3219_p4 }
  0x90   : > { %p3227_p3 = pnand %p3226_p1, %p3220_p10 }
  0x92   : > { %3230 = shalt.err (!%p3227_p3)
}
  0x93   : > { %s4344_s16 = smov 64   ;;  %s4345_s22 = sld [smem:[#allocation31_spill]] }
  0x94   : > { %2977 = dma.hbm_to_vmem [thread:$0]  (!%p3647_p6), %s4343_s12, 256, %s690_s24, [#allocation16], %s4344_s16, %s4344_s16, %s3461_s17  }
  0x99   : > { %s3231_s2 = scalar_lea.hbm %s4345_s22, 256 }
  0x9a   : > { %p3232_p1 = scmp.ne.s32.totalorder %s4345_s22, %s3231_s2  ;;  %p3238_p0 = scmp.lt.u32.totalorder %s3231_s2, %s4345_s22 }
  0x9c   : > { %p3234_p3 = pnand %p3232_p1, %p3663_p8 }
  0x9e   : > { %p3235_p13 = pneg %p3234_p3 }
  0xa0   : > { %p3240_p2 = pnand %p3238_p0, %p3235_p13 }
  0xa2   : > { %3243 = shalt.err (!%p3240_p2)
}
  0xa3   : > { %s3244_s23 = scalar_lea.vmem %s628_s1, 256  ;;  %p3252_p4 = scmp.lt.s32.totalorder %s628_s1, %s628_s1 }
  0xa4   : > { %p3245_p5 = scmp.ne.s32.totalorder %s628_s1, %s3244_s23  ;;  %p3253_p10 = scmp.lt.s32.totalorder %s3244_s23, %s3244_s23 }
  0xa6   : > { %p3247_p7 = pnand %p3245_p5, %p3663_p8  ;;  %p3254_p11 = por %p3253_p10, %p3252_p4 }
  0xa8   : > { %p3248_p9 = pneg %p3247_p7 }
  0xaa   : > { %p3255_p12 = pnand %p3254_p11, %p3248_p9 }
  0xac   : > { %3258 = shalt.err (!%p3255_p12)
}
  0xad   : > { %2962 = dma.hbm_to_vmem [thread:$0]  (!%p3647_p6), %s4345_s22, 256, %s628_s1, [#allocation7], %s4344_s16, %s4344_s16, %s3461_s17  }
  0xae   : > { %s3464_s4 = smov [#allocation11]   ;;  %s3465_s2 = smov [#allocation14]  }
  0xaf   : > { %s651_s25 = sshll.u32 %s3464_s4, 4  ;;  %s679_s30 = sshll.u32 %s3465_s2, 4  ;;  %s652_s25 = int_to_ptr.vmem [resolvable:$true] %s651_s25  ;;  %s680_s30 = int_to_ptr.vmem [resolvable:$true] %s679_s30 }
  0xb0   : > { %s4346_s8 = sld [smem:[#allocation33_spill]] }
  0xb6   : > { %s3259_s23 = scalar_lea.hbm %s4346_s8, 256 }
  0xb7   : > { %p3260_p1 = scmp.ne.s32.totalorder %s4346_s8, %s3259_s23  ;;  %p3266_p0 = scmp.lt.u32.totalorder %s3259_s23, %s4346_s8 }
  0xb9   : > { %p3262_p3 = pnand %p3260_p1, %p3663_p8 }
  0xbb   : > { %p3263_p13 = pneg %p3262_p3 }
  0xbd   : > { %p3268_p2 = pnand %p3266_p0, %p3263_p13 }
  0xbf   : > { %3271 = shalt.err (!%p3268_p2)
}
  0xc0   : > { %s3272_s1 = scalar_lea.vmem %s652_s25, 256  ;;  %p3280_p4 = scmp.lt.s32.totalorder %s652_s25, %s652_s25 }
  0xc1   : > { %p3273_p5 = scmp.ne.s32.totalorder %s652_s25, %s3272_s1  ;;  %p3281_p10 = scmp.lt.s32.totalorder %s3272_s1, %s3272_s1 }
  0xc3   : > { %p3275_p7 = pnand %p3273_p5, %p3663_p8  ;;  %p3282_p11 = por %p3281_p10, %p3280_p4 }
  0xc5   : > { %p3276_p9 = pneg %p3275_p7 }
  0xc7   : > { %p3283_p12 = pnand %p3282_p11, %p3276_p9 }
  0xc9   : > { %3286 = shalt.err (!%p3283_p12)
}
  0xca   : > { %2968 = dma.hbm_to_vmem [thread:$0]  (!%p3647_p6), %s4346_s8, 256, %s652_s25, [#allocation10], %s4344_s16, %s4344_s16, %s3461_s17  }
  0xcb   : > { %s4347_s11 = sld [smem:[#allocation36_spill]] }
  0xd1   : > { %s3287_s4 = scalar_lea.hbm %s4347_s11, 16 }
  0xd2   : > { %p3288_p1 = scmp.ne.s32.totalorder %s4347_s11, %s3287_s4  ;;  %p3294_p0 = scmp.lt.u32.totalorder %s3287_s4, %s4347_s11 }
  0xd4   : > { %p3290_p3 = pnand %p3288_p1, %p3663_p8 }
  0xd6   : > { %p3291_p13 = pneg %p3290_p3 }
  0xd8   : > { %p3296_p2 = pnand %p3294_p0, %p3291_p13 }
  0xda   : > { %3299 = shalt.err (!%p3296_p2)
}
  0xdb   : > { %s3300_s24 = scalar_lea.vmem %s680_s30, 16  ;;  %s3307_s17 = scalar_lea.vmem %s680_s30, 32 }
  0xdc   : > { %p3301_p5 = scmp.ne.s32.totalorder %s680_s30, %s3300_s24  ;;  %p3308_p4 = scmp.lt.s32.totalorder %s680_s30, %s680_s30 }
  0xdd   : > { %p3309_p10 = scmp.lt.s32.totalorder %s3307_s17, %s3300_s24 }
  0xde   : > { %p3303_p7 = pnand %p3301_p5, %p3663_p8 }
  0xdf   : > { %p3310_p11 = por %p3309_p10, %p3308_p4 }
  0xe0   : > { %p3304_p9 = pneg %p3303_p7 }
  0xe2   : > { %p3311_p12 = pnand %p3310_p11, %p3304_p9 }
  0xe4   : > { %3314 = shalt.err (!%p3311_p12)
}
  0xe5   : > { %2974 = dma.hbm_to_vmem [thread:$0]  (!%p3647_p6), %s4347_s11, 16, %s680_s30, [#allocation13]  }
  0xe6   : > { %s3466_s1 = smov [#allocation17]   ;;  %s3315_s21 = scalar_lea.hbm %s4279_s13, 16 }
  0xe7   : > { %s703_s9 = sshll.u32 %s3466_s1, 4  ;;  %p3316_p1 = scmp.ne.s32.totalorder %s4279_s13, %s3315_s21  ;;  %s704_s9 = int_to_ptr.vmem [resolvable:$true] %s703_s9 }
  0xe8   : > { %p3322_p0 = scmp.lt.u32.totalorder %s3315_s21, %s4279_s13 }
  0xe9   : > { %p3318_p3 = pnand %p3316_p1, %p3663_p8 }
  0xeb   : > { %p3319_p13 = pneg %p3318_p3 }
  0xed   : > { %p3324_p2 = pnand %p3322_p0, %p3319_p13 }
  0xef   : > { %3327 = shalt.err (!%p3324_p2)
}
  0xf0   : > { %s3328_s30 = scalar_lea.vmem %s704_s9, 16  ;;  %s3335_s23 = scalar_lea.vmem %s704_s9, 32 }
  0xf1   : > { %p3329_p5 = scmp.ne.s32.totalorder %s704_s9, %s3328_s30  ;;  %p3336_p4 = scmp.lt.s32.totalorder %s704_s9, %s704_s9 }
  0xf2   : > { %p3337_p10 = scmp.lt.s32.totalorder %s3335_s23, %s3328_s30 }
  0xf3   : > { %p3331_p7 = pnand %p3329_p5, %p3663_p8 }
  0xf4   : > { %p3338_p11 = por %p3337_p10, %p3336_p4 }
  0xf5   : > { %p3332_p9 = pneg %p3331_p7 }
  0xf7   : > { %p3339_p12 = pnand %p3338_p11, %p3332_p9 }
  0xf9   : > { %3342 = shalt.err (!%p3339_p12)
}
  0xfa   : > { %2980 = dma.hbm_to_vmem [thread:$0]  (!%p3647_p6), %s4279_s13, 16, %s704_s9, [#allocation16]  }
  0xfb   : > { %s2626_s7 = sadd.s32 4294967294, %s3455_s28   ;;  %s3836_s3 = sadd.s32 1, %s3455_s28  }
  0xfc   : > { %s126_s16 = ssub.s32 %s3455_s28, %s3836_s3  ;;  %s129_s25 = sadd.s32 1, %s3451_s27 }
  0xfd   : > { %p127_p8 = scmp.eq.s32.totalorder %s126_s16, 0  ;;  %p136_p1 = scmp.ne.s32.totalorder %s3451_s27, %s3447_s26 }
  0xfe   : > { %p137_p3 = scmp.eq.s32.totalorder %s3455_s28, 0  ;;  %p142_p13 = scmp.ne.s32.totalorder %s3447_s26, %s3443_s5 }
  0xff   : > { %s3847_s1 = scalar_select %p127_p8, %s3451_s27, %s129_s25  }
 0x100   : > { %p3849_p0 = por %p137_p3, %p136_p1  ;;  %p4349_p2 = scmp.eq.s32.totalorder %s3631_s29, 0 }
 0x101   : > { %p586_p5 = scmp.eq.s32.totalorder %s3631_s29, 1  ;;  %p592_p7 = scmp.eq.s32.totalorder %s2626_s7, 1 }
 0x102   : > { %p3855_p6 = por %p4349_p2, %p142_p13  ;;  %p2997_p9 = scmp.lt.s32.totalorder %s3455_s28, 2 }
 0x103   : > { %s765_s6 = sand.u32 1, %s3451_s27   ;;  %p3862_p4 = por %p586_p5, %p136_p1 }
 0x104   : > { %p3866_p10 = por %p592_p7, %p142_p13  ;;  %s2637_s2 = sshll.u32 %s765_s6, 3 }
 0x105   : > { %s4351_s21 = scalar_select %p3862_p4, 1, 0 }
 0x106   : > { %s4352_s4 = scalar_select %p3866_p10, 1, 0 }
 0x107   : > { %s2638_s20 = sshll.u32 %s3455_s28, 7  ;;  %s4353_s23 = sld [smem:[#allocation28_spill]] }
 0x108   : > { %s769_s17 = scalar_lea.vmem [#allocation3], %s2637_s2  ;;  %p3880_p11 = pnand %p2997_p9, %p3849_p0 }
 0x109   : > { %s776_s7 = sshll.u32 %s769_s17, 4  ;;  %s766_s25 = scalar_lea.sflag [#allocation4], %s765_s6  ;;  %s3876_s7 = int_to_ptr.vmem [resolvable:$true] %s776_s7 }
 0x10a   : > { %p3345_p8 = pneg %p3880_p11 }
 0x10d   : > { %s3874_s24 = scalar_lea.hbm %s4353_s23, %s2638_s20  ;;  %s3348_s14 = scalar_lea.hbm %s4353_s23, 256 }
 0x10e   : > { %s3343_s8 = scalar_lea.hbm %s3874_s24, 128  ;;  %p3349_p13 = scmp.lt.u32.totalorder %s3874_s24, %s4353_s23 }
 0x10f   : > { %p3344_p12 = scmp.ne.s32.totalorder %s3874_s24, %s3343_s8  ;;  %p3350_p0 = scmp.lt.u32.totalorder %s3348_s14, %s3343_s8 }
 0x110   : > { %p3352_p5 = scmp.lt.u32.totalorder %s3343_s8, %s3874_s24 }
 0x111   : > { %p3346_p1 = pnand %p3345_p8, %p3344_p12  ;;  %p3351_p2 = por %p3350_p0, %p3349_p13 }
 0x113   : > { %p3347_p3 = pneg %p3346_p1  ;;  %p3353_p7 = por %p3352_p5, %p3351_p2 }
 0x115   : > { %p3354_p9 = pnand %p3353_p7, %p3347_p3 }
 0x117   : > { %3357 = shalt.err (!%p3354_p9)
}
 0x118   : > { %s3358_s6 = scalar_lea.vmem %s3876_s7, 128  ;;  %s3467_s17 = smov [#allocation3]  }
 0x119   : > { %p3359_p12 = scmp.ne.s32.totalorder %s3876_s7, %s3358_s6  ;;  %s3363_s2 = sshll.u32 %s3467_s17, 4  ;;  %s3364_s2 = int_to_ptr.vmem [resolvable:$false] %s3363_s2 }
 0x11a   : > { %s3365_s20 = scalar_lea.vmem %s3364_s2, 256  ;;  %p3366_p4 = scmp.lt.s32.totalorder %s3876_s7, %s3364_s2 }
 0x11b   : > { %p3361_p1 = pnand %p3359_p12, %p3345_p8  ;;  %p3367_p13 = scmp.lt.s32.totalorder %s3365_s20, %s3358_s6 }
 0x11d   : > { %p3362_p10 = pneg %p3361_p1  ;;  %p3368_p0 = por %p3367_p13, %p3366_p4 }
 0x11f   : > { %p3369_p2 = pnand %p3368_p0, %p3362_p10 }
 0x121   : > { %3372 = shalt.err (!%p3369_p2)
}
 0x122   : > { %2984 = dma.hbm_to_vmem [thread:$0]  (!%p3880_p11), %s3874_s24, 128, %s3876_s7, %s766_s25  }
 0x123   : > { %p4355_p3 = scmp.ne.s32.totalorder %s4337_s0, 0 }
 0x124   : > { %s3912_s8 = sand.u32 (!%p4355_p3), 1, %s3447_s26  }
 0x125   : > { %785 = sbr.rel (%p4355_p3) target bundleno = 4637 (0x121d), region = 116  ;;  %s4306_s14 = sshll.u32 (!%p4355_p3), %s3912_s8, 3 }
 0x126   : > { %s788_s12 = scalar_lea.sflag (!%p4355_p3), [#allocation4], %s3912_s8  ;;  %s3918_s30 = scalar_lea.vmem (!%p4355_p3), [#allocation3], %s4306_s14 }
 0x12c   : > { %3418 = dma.done.wait (%p3855_p6), %s788_s12, 128  }
 0x12d   : > { %3420 = vsyncadd (%p3855_p6), %s788_s12, 4294967168  ;;  %p4356_p4 = scmp.eq.s32.totalorder %s3631_s29, 0 }
 0x12f   : > { %3422 = dma.done.wait (%p4356_p4), [#allocation7], 512   ;;  %p4357_p10 = pmov %p4356_p4 }
 0x130   : > { %p4358_p11 = pmov %p4356_p4 }
 0x131   : > { %3424 = vsyncadd (%p4357_p10), [#allocation7], 4294966784 }
 0x132   : > { %3426 = dma.done.wait (%p4358_p11), [#allocation10], 272   ;;  %p4359_p8 = pmov %p4356_p4 }
 0x133   : > { %p4360_p5 = pmov %p4356_p4 }
 0x134   : > { %3428 = vsyncadd (%p4359_p8), [#allocation10], 4294967024 }
 0x135   : > { %3430 = dma.done.wait (%p4360_p5), [#allocation13], 32   ;;  %p4361_p7 = pmov %p4356_p4 }
 0x136   : > { %p4362_p6 = pmov %p4356_p4 }
 0x137   : > { %3432 = vsyncadd (%p4361_p7), [#allocation13], 4294967264 }
 0x138   : > { %3434 = dma.done.wait (%p4362_p6), [#allocation16], 272   ;;  %p4363_p9 = pmov %p4356_p4 }
 0x139   : > { %p900_p12 = scmp.lt.s32.totalorder %s3631_s29, 1  ;;  %v3468_v0 = vmov 0.0   ;;  %vm3469_vm0 = vmmov 0   ;;  %s4364_s16 = sld [smem:[#allocation25_spill]]  ;;  %v3065_v1 = vld [vmem:[#allocation6] sm:$0xff]   ;;  %v3066_v2 = vld [vmem:[#allocation6 + $0x8] sm:$0xff]  }
 0x13a   : > { %3436 = vsyncadd (%p4363_p9), [#allocation16], 4294967024  ;;  %2764 = vmatprep.subr.bf16.mxu1 %v3468_v0  ;;  %2768 = vmatprep.mubr.msk.bf16.mxu1 %vm3469_vm0, %v3468_v0  ;;  %vm942_vm1 = vcmask 261120   ;;  %s4365_s2 = sld [smem:[#allocation30_spill]]  ;;  %s4313_s20 = smov 96   ;;  %vm992_vm2 = vcmask 64512  }
 0x13b   : > { %s901_s0 = scalar_select %p900_p12, %s3631_s29, 1  ;;  %2778 = vmatprep.subr.bf16.mxu0 %v3468_v0  ;;  %2780 = vmatprep.mubr.msk.bf16.mxu0 %vm3469_vm0, %v3468_v0  ;;  %vm1058_vm4 = vcmask 1043456   ;;  %vm1219_vm5 = vcmask 130112   ;;  %vm1336_vm6 = vcmask 195712   ;;  %vm1453_vm7 = vcmask 261312  }
 0x13c   : > { %2765 = vmatpush3.bf16.msra.mxu1 %v3065_v1  ;;  %s3471_s12 = smov 120   ;;  %s4312_s24 = smov 80   ;;  %vm2355_vm9 = vcmask 523264  }
 0x13d   : > { %s3948_s9 = sshll.u32 %s901_s0, 3  ;;  %2766 = vmatprep.subr.bf16.mxu1 %v3468_v0  ;;  %s4310_s0 = smov 88  }
 0x13e   : > { %s3474_s7 = smov 112   ;;  %s3478_s6 = smov 64  }
 0x13f   : > { %s903_s25 = scalar_lea.vmem %s4364_s16, %s3948_s9  ;;  %s4311_s16 = smov 72  }
 0x140   : > { %v3954_v3 = vld [vmem:[%s903_s25] sm:$0xff]  ;;  %2767 = vmatpush3.bf16.msra.mxu1 %v3066_v2  ;;  %s3476_s25 = smov 104   ;;  %s3479_s17 = smov 40  }
 0x141   : > { %v918_v4 = vpack.c.bf16 %v3954_v3, %v3954_v3  ;;  %2772 = vmatprep.subr.bf16.mxu1 %v3468_v0  ;;  %v2653_v5 = vld [vmem:[%s4365_s2] ss:$0 sm:$0xff]  ;;  %s4366_s2 = sld [smem:[#allocation27_spill]]  ;;  %p4386_p13 = scmp.ne.s32.totalorder %s4351_s21, 0 }
 0x142   : > { %s4367_s10 = sld [smem:[#allocation35_spill]] }
 0x143   : > { %2769 = vmatmul.mubr.msk.bf16.vlgmr.msra.gmra.mrb[0].mxu1 %vm942_vm1, %v918_v4 }
 0x144   : > { %2774 = vmatprep.mubr.msk.bf16.mxu1 %vm3469_vm0, %v3468_v0 }
 0x147   : > { %s911_s14 = scalar_lea.vmem %s4366_s2, %s3948_s9  ;;  %s3480_s2 = smov 48  }
 0x148   : > { %v916_v25 = vld [vmem:[%s911_s14] sm:$0xff]  ;;  %s3477_s14 = smov 56  }
 0x149   : > { %vm1039_vm3 = vcmp.gt.f32.partialorder %v916_v25, 0.0 }
 0x216   : > { %v980_v6 = vpop.f32.mrb[0].mxu1 }
 0x217   : > { %v981_v7 = vadd.f32 %v2653_v5, %v980_v6  ;;  %v2770_v8 = vpop.f32.mrb[1].mxu1 }
 0x218   : > { %v983_v9 = vpop.f32.mrb[2].mxu1 }
 0x219   : > { %v986_v10 = vmul.f32 0.35355338, %v981_v7  ;;  %v3966_v11 = vpack.c.bf16 %v981_v7, %v981_v7  ;;  %v2771_v12 = vpop.f32.mrb[3].mxu1 }
 0x21b   : > { %v987_v13 = vpack.c.bf16 %v986_v10, %v986_v10  ;;  %990 = vrot.lane.b32.xlu0 %v3966_v11, %s4313_s20 }
 0x21d   : > { %1104 = vrot.lane.b32.xlu1 %v987_v13, %s3471_s12 }
 0x21f   : > { %1106 = vrot.lane.b32.xlu0 %v3966_v11, %s4310_s0 }
 0x221   : > { %1223 = vrot.lane.b32.xlu1 %v3966_v11, %s4312_s24  ;;  %s4368_s24 = sld [smem:[#allocation26_spill]] }
 0x223   : > { %1221 = vrot.lane.b32.xlu0 %v987_v13, %s3474_s7 }
 0x225   : > { %1340 = vrot.lane.b32.xlu1 %v3966_v11, %s4311_s16  ;;  %s4372_s16 = smov 88  }
 0x227   : > { %1338 = vrot.lane.b32.xlu0 %v987_v13, %s3476_s25  ;;  %s907_s20 = scalar_lea.vmem %s4368_s24, %s3948_s9  ;;  %s4376_s9 = sld [smem:[#allocation38_spill]] }
 0x228   : > { %s4382_s24 = sld [smem:[#allocation44_spill]] }
 0x28d   : > { %v991_v14 = vpop.permute.xlu0 %990 }
 0x28e   : > { %v997_v15 = vsel %vm992_vm2, %v991_v14, 0 }
 0x28f   : > { %2773 = vmatpush3.bf16.xpose.msra.mxu1 %v997_v15  ;;  %v1105_v17 = vpop.permute.xlu1 %1104 }
 0x290   : > { %2784 = vmatprep.subr.bf16.mxu1 %v3468_v0 }
 0x291   : > { %v1107_v16 = vpop.permute.xlu0 %1106 }
 0x292   : > { %v1112_v18 = vsel %vm992_vm2, %v1107_v16, 0 }
 0x293   : > { %v1224_v19 = vpop.permute.xlu1 %1223 }
 0x294   : > { %v1229_v20 = vsel %vm992_vm2, %v1224_v19, 0 }
 0x295   : > { %v1222_v22 = vpop.permute.xlu0 %1221 }
 0x296   : > { %2775 = vmatmul.mubr.msk.bf16.vlgmr.msra.gmra.mrb[4].mxu1 %vm992_vm2, %v987_v13 }
 0x297   : > { %2785 = vmatpush3.bf16.xpose.msra.mxu1 %v1112_v18  ;;  %2786 = vmatprep.mubr.msk.bf16.mxu1 %vm3469_vm0, %v3468_v0  ;;  %v1341_v21 = vpop.permute.xlu1 %1340 }
 0x298   : > { %2796 = vmatprep.subr.bf16.mxu1 %v3468_v0  ;;  %v1346_v23 = vsel %vm992_vm2, %v1341_v21, 0 }
 0x299   : > { %v1339_v24 = vpop.permute.xlu0 %1338 }
 0x29e   : > { %2787 = vmatmul.mubr.msk.bf16.vlgmr.msra.gmra.mrb[8].mxu1 %vm992_vm2, %v1105_v17 }
 0x29f   : > { %2797 = vmatpush3.bf16.xpose.msra.mxu1 %v1229_v20  ;;  %2798 = vmatprep.mubr.msk.bf16.mxu1 %vm3469_vm0, %v3468_v0 }
 0x2a0   : > { %2808 = vmatprep.subr.bf16.mxu1 %v3468_v0 }
 0x2a6   : > { %2799 = vmatmul.mubr.msk.bf16.vlgmr.msra.gmra.mrb[12].mxu1 %vm992_vm2, %v1222_v22 }
 0x2a7   : > { %2809 = vmatpush3.bf16.xpose.msra.mxu1 %v1346_v23  ;;  %2810 = vmatprep.mubr.msk.bf16.mxu1 %vm3469_vm0, %v3468_v0 }
 0x2a8   : > { %2820 = vmatprep.subr.bf16.mxu1 %v3468_v0 }
 0x2ae   : > { %2811 = vmatmul.mubr.msk.bf16.vlgmr.msra.gmra.mrb[16].mxu1 %vm992_vm2, %v1339_v24 }
 0x2af   : > { %2824 = vmatprep.mubr.msk.bf16.mxu1 %vm3469_vm0, %v3468_v0 }
 0x369   : > { %v1033_v26 = vpop.f32.mrb[4].mxu1 }
 0x36a   : > { %v1040_v27 = vsel %vm1039_vm3, %v1033_v26, -1e+09  ;;  %v2776_v28 = vpop.f32.mrb[5].mxu1 }
 0x36b   : > { %v1036_v29 = vpop.f32.mrb[6].mxu1  ;;  %v1041_v30 = vsel %vm992_vm2, %v1040_v27, -inf }
 0x36c   : > { %1042 = vmax.xlane.f32.xlu1 %v1041_v30  ;;  %v2777_v31 = vpop.f32.mrb[7].mxu1 }
 0x371   : > { %v1148_v32 = vpop.f32.mrb[8].mxu1 }
 0x372   : > { %v1154_v33 = vsel %vm1039_vm3, %v1148_v32, -1e+09  ;;  %v2788_v34 = vpop.f32.mrb[9].mxu1 }
 0x373   : > { %v1151_v35 = vpop.f32.mrb[10].mxu1  ;;  %v1155_v36 = vsel %vm992_vm2, %v1154_v33, -inf }
 0x374   : > { %1156 = vmax.xlane.f32.xlu0 %v1155_v36  ;;  %v2789_v37 = vpop.f32.mrb[11].mxu1 }
 0x379   : > { %v1265_v38 = vpop.f32.mrb[12].mxu1 }
 0x37a   : > { %v1271_v39 = vsel %vm1039_vm3, %v1265_v38, -1e+09  ;;  %v2800_v40 = vpop.f32.mrb[13].mxu1 }
 0x37b   : > { %v1268_v41 = vpop.f32.mrb[14].mxu1  ;;  %v1272_v42 = vsel %vm992_vm2, %v1271_v39, -inf  ;;  %v3067_v40 = vld [vmem:[#allocation8] sm:$0xff]  }
 0x37c   : > { %1273 = vmax.xlane.f32.xlu0 %v1272_v42  ;;  %v2801_v43 = vpop.f32.mrb[15].mxu1  ;;  %2821 = vmatpush3.bf16.msra.mxu1 %v3067_v40  ;;  %v3068_v41 = vld [vmem:[#allocation8 + $0x8] sm:$0xff]  }
 0x37d   : > { %2822 = vmatprep.subr.bf16.mxu1 %v3468_v0 }
 0x380   : > { %2823 = vmatpush3.bf16.msra.mxu1 %v3068_v41 }
 0x381   : > { %v1382_v44 = vpop.f32.mrb[16].mxu1  ;;  %2836 = vmatprep.subr.bf16.mxu1 %v3468_v0 }
 0x382   : > { %v1388_v45 = vsel %vm1039_vm3, %v1382_v44, -1e+09  ;;  %v2812_v46 = vpop.f32.mrb[17].mxu1 }
 0x383   : > { %v1385_v47 = vpop.f32.mrb[18].mxu1  ;;  %v1389_v48 = vsel %vm992_vm2, %v1388_v45, -inf }
 0x384   : > { %1390 = vmax.xlane.f32.xlu1 %v1389_v48  ;;  %v2813_v49 = vpop.f32.mrb[19].mxu1 }
 0x3f9   : > { %v1043_v50 = vpop.xlane.xlu1 %1042 }
 0x3fa   : > { %v1044_v51 = vsub.f32 %v1040_v27, %v1043_v50 }
 0x3fc   : > { %v1045_v52 = vmul.f32 1.442695, %v1044_v51 }
 0x3fe   : > { %3081 = vpow2.f32 %v1045_v52 }
 0x401   : > { %v1157_v53 = vpop.xlane.xlu0 %1156 }
 0x402   : > { %v1158_v54 = vsub.f32 %v1154_v33, %v1157_v53 }
 0x404   : > { %v1159_v55 = vmul.f32 1.442695, %v1158_v54 }
 0x406   : > { %3083 = vpow2.f32 %v1159_v55  ;;  %v2665_v55 = vld [vmem:[#allocation9] ss:$0 sm:$0xff] }
 0x408   : > { %v3082_v56 = vpop.eup %3081 }
 0x409   : > { %v1274_v57 = vpop.xlane.xlu0 %1273  ;;  %v1047_v58 = vsel %vm992_vm2, %v3082_v56, 0.0 }
 0x40a   : > { %v1275_v59 = vsub.f32 %v1271_v39, %v1274_v57  ;;  %1048 = vadd.xlane.f32.xlu0 %v1047_v58 }
 0x40c   : > { %v1276_v60 = vmul.f32 1.442695, %v1275_v59 }
 0x40e   : > { %3085 = vpow2.f32 %v1276_v60 }
 0x410   : > { %v3084_v61 = vpop.eup %3083 }
 0x411   : > { %v1161_v62 = vsel %vm992_vm2, %v3084_v61, 0.0  ;;  %v1391_v2 = vpop.xlane.xlu1 %1390 }
 0x412   : > { %1162 = vadd.xlane.f32.xlu1 %v1161_v62  ;;  %v1392_v4 = vsub.f32 %v1388_v45, %v1391_v2 }
 0x414   : > { %v1393_v5 = vmul.f32 1.442695, %v1392_v4 }
 0x416   : > { %3087 = vpow2.f32 %v1393_v5 }
 0x418   : > { %v3086_v63 = vpop.eup %3085 }
 0x419   : > { %v1278_v1 = vsel %vm992_vm2, %v3086_v63, 0.0 }
 0x41a   : > { %1279 = vadd.xlane.f32.xlu0 %v1278_v1 }
 0x420   : > { %v3088_v6 = vpop.eup %3087 }
 0x421   : > { %v1395_v7 = vsel %vm992_vm2, %v3088_v6, 0.0 }
 0x423   : > { %1167 = vrot.lane.b32.xlu1 %v3966_v11, %s3477_s14  ;;  %s4309_s14 = smov 8  }
 0x430   : > { %1053 = vrot.lane.b32.xlu0 %v3966_v11, %s3478_s6  ;;  %s4308_s6 = smov 16  }
 0x434   : > { %1401 = vrot.lane.b32.xlu0 %v3966_v11, %s3479_s17  ;;  %s4307_s17 = smov 24  }
 0x447   : > { %1396 = vadd.xlane.f32.xlu1 %v1395_v7  ;;  %v914_v7 = vld [vmem:[%s907_s20] sm:$0xff]  ;;  %s4379_s20 = sld [smem:[#allocation43_spill]] }
 0x458   : > { %1284 = vrot.lane.b32.xlu1 %v3966_v11, %s3480_s2  ;;  %s4381_s2 = sld [smem:[#allocation41_spill]] }
 0x497   : > { %v1049_v8 = vpop.xlane.xlu0 %1048 }
 0x498   : > { %3089 = vrcp.f32 %v1049_v8  ;;  %v915_v8 = vpack.c.bf16 %v914_v7, %v914_v7 }
 0x49f   : > { %v1163_v9 = vpop.xlane.xlu1 %1162 }
 0x4a0   : > { %3091 = vrcp.f32 %v1163_v9  ;;  %v3071_v9 = vld [vmem:[#allocation11] sm:$0xff]  }
 0x4a2   : > { %v3090_v10 = vpop.eup %3089 }
 0x4a3   : > { %v1051_v13 = vmul.f32 %v3090_v10, %v3082_v56  ;;  %v1168_v16 = vpop.permute.xlu1 %1167  ;;  %v3072_v10 = vld [vmem:[#allocation11 + $0x8] sm:$0xff]  }
 0x4a4   : > { %v1173_v19 = vsel %vm1058_vm4, %v1168_v16, 0  ;;  %v2669_v16 = vld [vmem:[%s4284_s18] ss:$0 sm:$0xff] }
 0x4a5   : > { %v1052_v17 = vpack.c.bf16 %v1051_v13, %v1051_v13 }
 0x4a7   : > { %v1280_v12 = vpop.xlane.xlu0 %1279 }
 0x4a8   : > { %3093 = vrcp.f32 %v1280_v12 }
 0x4aa   : > { %v3092_v18 = vpop.eup %3091 }
 0x4ab   : > { %v1054_v14 = vpop.permute.xlu0 %1053  ;;  %v1165_v11 = vmul.f32 %v3092_v18, %v3084_v61  ;;  %v2670_v18 = vld [vmem:[%s4285_s19] ss:$0 sm:$0xff] }
 0x4ac   : > { %v1060_v15 = vsel %vm1058_vm4, %v1054_v14, 0 }
 0x4ad   : > { %2779 = vmatpush3.bf16.msra.mxu0 %v1060_v15  ;;  %v1166_v20 = vpack.c.bf16 %v1165_v11, %v1165_v11 }
 0x4ae   : > { %2790 = vmatprep.subr.bf16.mxu0 %v3468_v0 }
 0x4af   : > { %v1402_v26 = vpop.permute.xlu0 %1401 }
 0x4b0   : > { %2781 = vmatmul.mubr.msk.bf16.vlgmr.msra.gmra.mrb[0].mxu0 %vm992_vm2, %v1052_v17  ;;  %v1407_v28 = vsel %vm1058_vm4, %v1402_v26, 0 }
 0x4b1   : > { %2791 = vmatpush3.bf16.msra.mxu0 %v1173_v19  ;;  %2792 = vmatprep.mubr.msk.bf16.mxu0 %vm3469_vm0, %v3468_v0 }
 0x4b2   : > { %2802 = vmatprep.subr.bf16.mxu0 %v3468_v0  ;;  %v3094_v21 = vpop.eup %3093 }
 0x4b3   : > { %v1282_v23 = vmul.f32 %v3094_v21, %v3086_v63  ;;  %v2675_v21 = vld [vmem:[#allocation14] ss:$0 sm:$0xff] }
 0x4b5   : > { %v1283_v27 = vpack.c.bf16 %v1282_v23, %v1282_v23 }
 0x4b8   : > { %2793 = vmatmul.mubr.msk.bf16.vlgmr.msra.gmra.mrb[4].mxu0 %vm992_vm2, %v1166_v20 }
 0x4b9   : > { %2804 = vmatprep.mubr.msk.bf16.mxu0 %vm3469_vm0, %v3468_v0 }
 0x4d4   : > { %v1397_v22 = vpop.xlane.xlu1 %1396 }
 0x4d5   : > { %3095 = vrcp.f32 %v1397_v22 }
 0x4d8   : > { %v1285_v24 = vpop.permute.xlu1 %1284 }
 0x4d9   : > { %v1290_v25 = vsel %vm1058_vm4, %v1285_v24, 0 }
 0x4da   : > { %2803 = vmatpush3.bf16.msra.mxu0 %v1290_v25 }
 0x4db   : > { %2814 = vmatprep.subr.bf16.mxu0 %v3468_v0 }
 0x4dd   : > { %2805 = vmatmul.mubr.msk.bf16.vlgmr.msra.gmra.mrb[8].mxu0 %vm992_vm2, %v1283_v27 }
 0x4de   : > { %2815 = vmatpush3.bf16.msra.mxu0 %v1407_v28  ;;  %2816 = vmatprep.mubr.msk.bf16.mxu0 %vm3469_vm0, %v3468_v0 }
 0x4df   : > { %v3096_v29 = vpop.eup %3095  ;;  %2828 = vmatprep.subr.bf16.mxu0 %v3468_v0 }
 0x4e0   : > { %v1399_v30 = vmul.f32 %v3096_v29, %v3088_v6  ;;  %v3069_v6 = vld [vmem:[%s4367_s10] sm:$0xff]   ;;  %v2671_v29 = vld [vmem:[#allocation12] ss:$0 sm:$0xff] }
 0x4e2   : > { %v1400_v31 = vpack.c.bf16 %v1399_v30, %v1399_v30 }
 0x4e5   : > { %2817 = vmatmul.mubr.msk.bf16.vlgmr.msra.gmra.mrb[12].mxu0 %vm992_vm2, %v1400_v31 }
 0x4e6   : > { %2832 = vmatprep.mubr.msk.bf16.mxu0 %vm3469_vm0, %v3468_v0  ;;  %2829 = vmatpush3.bf16.msra.mxu0 %v3071_v9 }
 0x4e7   : > { %2830 = vmatprep.subr.bf16.mxu0 %v3468_v0 }
 0x4ea   : > { %2831 = vmatpush3.bf16.msra.mxu0 %v3072_v10 }
 0x4eb   : > { %2844 = vmatprep.subr.bf16.mxu0 %v3468_v0 }
 0x583   : > { %v1096_v32 = vpop.f32.mrb[0].mxu0 }
 0x584   : > { %1102 = vst.msk [vmem:[#allocation2] sm:$0xff] %vm992_vm2, %v1096_v32  ;;  %v2782_v33 = vpop.f32.mrb[1].mxu0 }
 0x585   : > { %v1099_v34 = vpop.f32.mrb[2].mxu0 }
 0x586   : > { %v2783_v35 = vpop.f32.mrb[3].mxu0 }
 0x58b   : > { %v1209_v36 = vpop.f32.mrb[4].mxu0 }
 0x58c   : > { %1216 = vrot.lane.b32.xlu1 %v1209_v36, %s4309_s14  ;;  %v2794_v37 = vpop.f32.mrb[5].mxu0  ;;  %s4374_s14 = smov 16  }
 0x58d   : > { %v1212_v38 = vpop.f32.mrb[6].mxu0 }
 0x58e   : > { %v2795_v39 = vpop.f32.mrb[7].mxu0 }
 0x5b0   : > { %v1326_v42 = vpop.f32.mrb[8].mxu0 }
 0x5b1   : > { %1333 = vrot.lane.b32.xlu0 %v1326_v42, %s4308_s6  ;;  %v2806_v43 = vpop.f32.mrb[9].mxu0  ;;  %s4375_s6 = smov 24  }
 0x5b2   : > { %v1329_v44 = vpop.f32.mrb[10].mxu0 }
 0x5b3   : > { %v2807_v45 = vpop.f32.mrb[11].mxu0 }
 0x5b8   : > { %v1443_v46 = vpop.f32.mrb[12].mxu0 }
 0x5b9   : > { %1450 = vrot.lane.b32.xlu1 %v1443_v46, %s4307_s17  ;;  %v2818_v47 = vpop.f32.mrb[13].mxu0  ;;  %v917_v46 = vld [vmem:[%s3918_s30] sm:$0xff]  ;;  %s4369_s30 = smov 96  }
 0x5ba   : > { %v1446_v48 = vpop.f32.mrb[14].mxu0  ;;  %vm1736_vm8 = vcmp.gt.f32.partialorder %v917_v46, 0.0 }
 0x5bb   : > { %v2819_v49 = vpop.f32.mrb[15].mxu0 }
 0x5fe   : > { %v1217_v50 = vpop.permute.xlu1 %1216 }
 0x5ff   : > { %1220 = vst.msk [vmem:[#allocation2] sm:$0xff] %vm1219_vm5, %v1217_v50 }
 0x623   : > { %v1334_v51 = vpop.permute.xlu0 %1333 }
 0x624   : > { %1337 = vst.msk [vmem:[#allocation2] sm:$0xff] %vm1336_vm6, %v1334_v51 }
 0x62b   : > { %v1451_v52 = vpop.permute.xlu1 %1450 }
 0x62c   : > { %1454 = vst.msk [vmem:[#allocation2] sm:$0xff] %vm1453_vm7, %v1451_v52 }
 0x633   : > { %v1455_v53 = vld [vmem:[#allocation2] sm:$0xff] }
 0x634   : > { %v1456_v54 = vpack.c.bf16 %v1455_v53, %v1455_v53 }
 0x636   : > { %2825 = vmatmul.mubr.msk.bf16.vlgmr.msra.gmra.mrb[20].mxu1 %vm942_vm1, %v1456_v54 }
 0x637   : > { %2840 = vmatprep.mubr.msk.bf16.mxu1 %vm3469_vm0, %v3468_v0  ;;  %2837 = vmatpush3.bf16.msra.mxu1 %v3069_v6 }
 0x638   : > { %2838 = vmatprep.subr.bf16.mxu1 %v3468_v0 }
 0x709   : > { %v1517_v56 = vpop.f32.mrb[20].mxu1 }
 0x70a   : > { %v1518_v57 = vadd.f32 %v2665_v55, %v1517_v56  ;;  %v2826_v58 = vpop.f32.mrb[21].mxu1 }
 0x70b   : > { %v1520_v59 = vpop.f32.mrb[22].mxu1 }
 0x70c   : > { %v2827_v60 = vpop.f32.mrb[23].mxu1  ;;  %v1523_v61 = vadd.f32 %v1518_v57, %v3954_v3  ;;  %v3070_v3 = vld [vmem:[%s4367_s10 + $0x8] sm:$0xff]   ;;  %s4385_s10 = sld [smem:[#allocation46_spill]] }
 0x70d   : > { %2839 = vmatpush3.bf16.msra.mxu1 %v3070_v3 }
 0x70e   : > { %v1526_v62 = vsel %vm942_vm1, %v1523_v61, 0.0  ;;  %2850 = vmatprep.subr.bf16.mxu1 %v3468_v0 }
 0x70f   : > { %1527 = vadd.xlane.f32.xlu0 %v1526_v62 }
 0x710   : > { %2841 = vmatmul.mubr.msk.bf16.vlgmr.msra.gmra.mrb[24].mxu1 %vm942_vm1, %v915_v8 }
 0x711   : > { %2852 = vmatprep.mubr.msk.bf16.mxu1 %vm3469_vm0, %v3468_v0 }
 0x79c   : > { %v1528_v63 = vpop.xlane.xlu0 %1527 }
 0x79d   : > { %v1530_v1 = vmul.f32 0.03125, %v1528_v63 }
 0x79f   : > { %v1531_v2 = vsub.f32 %v1523_v61, %v1530_v1 }
 0x7a1   : > { %v1532_v4 = vmul.f32 %v1531_v2, %v1531_v2 }
 0x7a3   : > { %v1533_v5 = vsel %vm942_vm1, %v1532_v4, 0.0 }
 0x7a4   : > { %1534 = vadd.xlane.f32.xlu1 %v1533_v5 }
 0x7e3   : > { %v1681_v22 = vpop.f32.mrb[24].mxu1 }
 0x7e4   : > { %v1682_v23 = vadd.f32 %v2675_v21, %v1681_v22  ;;  %v2842_v24 = vpop.f32.mrb[25].mxu1 }
 0x7e5   : > { %v1684_v25 = vpop.f32.mrb[26].mxu1 }
 0x7e6   : > { %v4084_v26 = vpack.c.bf16 %v1682_v23, %v1682_v23  ;;  %v2843_v27 = vpop.f32.mrb[27].mxu1 }
 0x7e8   : > { %1803 = vrot.lane.b32.xlu0 %v4084_v26, %s3471_s12  ;;  %v1694_v28 = vsel %vm992_vm2, %v4084_v26, 0 }
 0x7ec   : > { %1919 = vrot.lane.b32.xlu0 %v4084_v26, %s3474_s7 }
 0x7f0   : > { %2035 = vrot.lane.b32.xlu0 %v4084_v26, %s3476_s25 }
 0x831   : > { %v1535_v12 = vpop.xlane.xlu1 %1534 }
 0x832   : > { %v1536_v13 = vmul.f32 0.03125, %v1535_v12 }
 0x834   : > { %v1537_v14 = vadd.f32 1e-05, %v1536_v13 }
 0x836   : > { %3097 = vrsqrt.f32 %v1537_v14 }
 0x840   : > { %v3098_v15 = vpop.eup %3097 }
 0x841   : > { %v1539_v17 = vmul.f32 %v3098_v15, %v1531_v2 }
 0x843   : > { %v1546_v19 = vmul.f32 %v2669_v16, %v1539_v17 }
 0x845   : > { %v4077_v11 = vadd.f32 %v2670_v18, %v1546_v19 }
 0x847   : > { %v1554_v20 = vpack.c.bf16 %v4077_v11, %v4077_v11 }
 0x849   : > { %2833 = vmatmul.mubr.msk.bf16.vlgmr.msra.gmra.mrb[16].mxu0 %vm942_vm1, %v1554_v20 }
 0x84a   : > { %2846 = vmatprep.mubr.msk.bf16.mxu0 %vm3469_vm0, %v3468_v0  ;;  %2845 = vmatpush3.bf16.xpose.msra.mxu0 %v1694_v28 }
 0x84b   : > { %2856 = vmatprep.subr.bf16.mxu0 %v3468_v0 }
 0x85a   : > { %v1804_v36 = vpop.permute.xlu0 %1803 }
 0x85b   : > { %v1809_v38 = vsel %vm992_vm2, %v1804_v36, 0 }
 0x85e   : > { %v1920_v39 = vpop.permute.xlu0 %1919 }
 0x85f   : > { %v1925_v41 = vsel %vm992_vm2, %v1920_v39, 0 }
 0x862   : > { %v2036_v42 = vpop.permute.xlu0 %2035 }
 0x863   : > { %v2041_v44 = vsel %vm992_vm2, %v2036_v42, 0 }
 0x91c   : > { %v1615_v30 = vpop.f32.mrb[16].mxu0 }
 0x91d   : > { %v1616_v31 = vadd.f32 %v2671_v29, %v1615_v30  ;;  %v2834_v32 = vpop.f32.mrb[17].mxu0 }
 0x91e   : > { %v1618_v33 = vpop.f32.mrb[18].mxu0 }
 0x91f   : > { %v1687_v34 = vmul.f32 0.35355338, %v1616_v31  ;;  %v2835_v35 = vpop.f32.mrb[19].mxu0 }
 0x921   : > { %v1688_v37 = vpack.c.bf16 %v1687_v34, %v1687_v34 }
 0x923   : > { %1801 = vrot.lane.b32.xlu1 %v1688_v37, %s3471_s12  ;;  %2847 = vmatmul.mubr.msk.bf16.vlgmr.msra.gmra.mrb[20].mxu0 %vm992_vm2, %v1688_v37  ;;  %s4370_s12 = smov 80  }
 0x924   : > { %2857 = vmatpush3.bf16.xpose.msra.mxu0 %v1809_v38  ;;  %2858 = vmatprep.mubr.msk.bf16.mxu0 %vm3469_vm0, %v3468_v0 }
 0x925   : > { %2868 = vmatprep.subr.bf16.mxu0 %v3468_v0 }
 0x927   : > { %1917 = vrot.lane.b32.xlu1 %v1688_v37, %s3474_s7  ;;  %s4371_s7 = smov 72  }
 0x92b   : > { %2033 = vrot.lane.b32.xlu1 %v1688_v37, %s3476_s25  ;;  %s4373_s25 = smov 8  }
 0x995   : > { %v1802_v40 = vpop.permute.xlu1 %1801 }
 0x996   : > { %2859 = vmatmul.mubr.msk.bf16.vlgmr.msra.gmra.mrb[24].mxu0 %vm992_vm2, %v1802_v40 }
 0x997   : > { %2869 = vmatpush3.bf16.xpose.msra.mxu0 %v1925_v41  ;;  %2870 = vmatprep.mubr.msk.bf16.mxu0 %vm3469_vm0, %v3468_v0 }
 0x998   : > { %2880 = vmatprep.subr.bf16.mxu0 %v3468_v0 }
 0x999   : > { %v1918_v43 = vpop.permute.xlu1 %1917 }
 0x99d   : > { %v2034_v45 = vpop.permute.xlu1 %2033 }
 0x99e   : > { %2871 = vmatmul.mubr.msk.bf16.vlgmr.msra.gmra.mrb[28].mxu0 %vm992_vm2, %v1918_v43 }
 0x99f   : > { %2881 = vmatpush3.bf16.xpose.msra.mxu0 %v2041_v44  ;;  %2882 = vmatprep.mubr.msk.bf16.mxu0 %vm3469_vm0, %v3468_v0 }
 0x9a0   : > { %2892 = vmatprep.subr.bf16.mxu0 %v3468_v0 }
 0x9a6   : > { %2883 = vmatmul.mubr.msk.bf16.vlgmr.msra.gmra.mrb[32].mxu0 %vm992_vm2, %v2034_v45 }
 0x9a7   : > { %2896 = vmatprep.mubr.msk.bf16.mxu0 %vm3469_vm0, %v3468_v0 }
 0x9f6   : > { %v1730_v47 = vpop.f32.mrb[20].mxu0 }
 0x9f7   : > { %v1737_v48 = vsel %vm1736_vm8, %v1730_v47, -1e+09  ;;  %v2848_v49 = vpop.f32.mrb[21].mxu0 }
 0x9f8   : > { %v1733_v50 = vpop.f32.mrb[22].mxu0  ;;  %v1738_v51 = vsel %vm992_vm2, %v1737_v48, -inf }
 0x9f9   : > { %1739 = vmax.xlane.f32.xlu0 %v1738_v51  ;;  %v2849_v52 = vpop.f32.mrb[23].mxu0 }
 0xa69   : > { %v1845_v53 = vpop.f32.mrb[24].mxu0 }
 0xa6a   : > { %v1851_v54 = vsel %vm1736_vm8, %v1845_v53, -1e+09  ;;  %v2860_v55 = vpop.f32.mrb[25].mxu0 }
 0xa6b   : > { %v1848_v56 = vpop.f32.mrb[26].mxu0  ;;  %v1852_v57 = vsel %vm992_vm2, %v1851_v54, -inf }
 0xa6c   : > { %1853 = vmax.xlane.f32.xlu1 %v1852_v57  ;;  %v2861_v58 = vpop.f32.mrb[27].mxu0 }
 0xa71   : > { %v1961_v59 = vpop.f32.mrb[28].mxu0 }
 0xa72   : > { %v1967_v60 = vsel %vm1736_vm8, %v1961_v59, -1e+09  ;;  %v2872_v61 = vpop.f32.mrb[29].mxu0 }
 0xa73   : > { %v1964_v62 = vpop.f32.mrb[30].mxu0  ;;  %v1968_v63 = vsel %vm992_vm2, %v1967_v60, -inf  ;;  %v3073_v61 = vld [vmem:[#allocation15] sm:$0xff]  }
 0xa74   : > { %1969 = vmax.xlane.f32.xlu0 %v1968_v63  ;;  %v2873_v1 = vpop.f32.mrb[31].mxu0  ;;  %2893 = vmatpush3.bf16.msra.mxu0 %v3073_v61  ;;  %v3074_v62 = vld [vmem:[#allocation15 + $0x8] sm:$0xff]  }
 0xa75   : > { %2894 = vmatprep.subr.bf16.mxu0 %v3468_v0 }
 0xa78   : > { %2895 = vmatpush3.bf16.msra.mxu0 %v3074_v62 }
 0xa79   : > { %v2077_v2 = vpop.f32.mrb[32].mxu0  ;;  %2908 = vmatprep.subr.bf16.mxu0 %v3468_v0 }
 0xa7a   : > { %v2083_v4 = vsel %vm1736_vm8, %v2077_v2, -1e+09  ;;  %v2884_v5 = vpop.f32.mrb[33].mxu0 }
 0xa7b   : > { %v2080_v6 = vpop.f32.mrb[34].mxu0  ;;  %v2084_v3 = vsel %vm992_vm2, %v2083_v4, -inf }
 0xa7c   : > { %2085 = vmax.xlane.f32.xlu0 %v2084_v3  ;;  %v2885_v7 = vpop.f32.mrb[35].mxu0 }
 0xa86   : > { %v1740_v8 = vpop.xlane.xlu0 %1739 }
 0xa87   : > { %v1741_v9 = vsub.f32 %v1737_v48, %v1740_v8 }
 0xa89   : > { %v1742_v10 = vmul.f32 1.442695, %v1741_v9 }
 0xa8b   : > { %3099 = vpow2.f32 %v1742_v10 }
 0xa95   : > { %v3100_v12 = vpop.eup %3099 }
 0xa96   : > { %v1744_v13 = vsel %vm992_vm2, %v3100_v12, 0.0 }
 0xa97   : > { %1745 = vadd.xlane.f32.xlu1 %v1744_v13 }
 0xaa8   : > { %1751 = vrot.lane.b32.xlu1 %v4084_v26, %s4369_s30 }
 0xaf9   : > { %v1854_v14 = vpop.xlane.xlu1 %1853 }
 0xafa   : > { %v1855_v15 = vsub.f32 %v1851_v54, %v1854_v14  ;;  %v2687_v14 = vld [vmem:[#allocation17] ss:$0 sm:$0xff] }
 0xafc   : > { %v1856_v16 = vmul.f32 1.442695, %v1855_v15 }
 0xafe   : > { %3101 = vpow2.f32 %v1856_v16 }
 0xb01   : > { %v1970_v17 = vpop.xlane.xlu0 %1969 }
 0xb02   : > { %v1971_v18 = vsub.f32 %v1967_v60, %v1970_v17 }
 0xb04   : > { %v1972_v19 = vmul.f32 1.442695, %v1971_v18 }
 0xb06   : > { %3103 = vpow2.f32 %v1972_v19 }
 0xb08   : > { %v3102_v20 = vpop.eup %3101 }
 0xb09   : > { %v2086_v21 = vpop.xlane.xlu0 %2085  ;;  %v1858_v22 = vsel %vm992_vm2, %v3102_v20, 0.0 }
 0xb0a   : > { %v2087_v23 = vsub.f32 %v2083_v4, %v2086_v21  ;;  %1859 = vadd.xlane.f32.xlu0 %v1858_v22 }
 0xb0c   : > { %v2088_v24 = vmul.f32 1.442695, %v2087_v23 }
 0xb0e   : > { %3105 = vpow2.f32 %v2088_v24 }
 0xb10   : > { %v3104_v25 = vpop.eup %3103 }
 0xb11   : > { %v1974_v27 = vsel %vm992_vm2, %v3104_v25, 0.0 }
 0xb12   : > { %1975 = vadd.xlane.f32.xlu1 %v1974_v27 }
 0xb18   : > { %v3106_v28 = vpop.eup %3105 }
 0xb19   : > { %v2090_v29 = vsel %vm992_vm2, %v3106_v28, 0.0 }
 0xb1a   : > { %2091 = vadd.xlane.f32.xlu0 %v2090_v29  ;;  %v3076_v29 = vld [vmem:[%s4376_s9 + $0x8] sm:$0xff]  }
 0xb23   : > { %1980 = vrot.lane.b32.xlu1 %v4084_v26, %s4370_s12  ;;  %s4377_s12 = sld [smem:[#allocation40_spill]] }
 0xb24   : > { %v1746_v30 = vpop.xlane.xlu1 %1745 }
 0xb25   : > { %3107 = vrcp.f32 %v1746_v30 }
 0xb27   : > { %2096 = vrot.lane.b32.xlu1 %v4084_v26, %s4371_s7 }
 0xb28   : > { %v1752_v31 = vpop.permute.xlu1 %1751 }
 0xb29   : > { %v1757_v32 = vsel %vm1058_vm4, %v1752_v31, 0  ;;  %v3078_v30 = vld [vmem:[%s4377_s12 + $0x8] sm:$0xff]  }
 0xb2a   : > { %2851 = vmatpush3.bf16.msra.mxu1 %v1757_v32 }
 0xb2b   : > { %2862 = vmatprep.subr.bf16.mxu1 %v3468_v0 }
 0xb2f   : > { %v3108_v33 = vpop.eup %3107 }
 0xb30   : > { %v1748_v34 = vmul.f32 %v3108_v33, %v3100_v12  ;;  %1864 = vrot.lane.b32.xlu0 %v4084_v26, %s4372_s16  ;;  %s4383_s16 = sld [smem:[#allocation45_spill]] }
 0xb32   : > { %v1749_v35 = vpack.c.bf16 %v1748_v34, %v1748_v34 }
 0xb34   : > { %2853 = vmatmul.mubr.msk.bf16.vlgmr.msra.gmra.mrb[28].mxu1 %vm992_vm2, %v1749_v35 }
 0xb35   : > { %2864 = vmatprep.mubr.msk.bf16.mxu1 %vm3469_vm0, %v3468_v0 }
 0xb97   : > { %v1860_v36 = vpop.xlane.xlu0 %1859 }
 0xb98   : > { %3109 = vrcp.f32 %v1860_v36 }
 0xb9f   : > { %v1976_v37 = vpop.xlane.xlu1 %1975 }
 0xba0   : > { %3111 = vrcp.f32 %v1976_v37  ;;  %v2692_v37 = vld [vmem:[%s4379_s20] ss:$0 sm:$0xff]  ;;  %s2431_s20 = scalar_lea.sflag [#allocation5], %s3912_s8 }
 0xba2   : > { %v3110_v38 = vpop.eup %3109 }
 0xba3   : > { %v1862_v40 = vmul.f32 %v3110_v38, %v3102_v20  ;;  %v1981_v43 = vpop.permute.xlu1 %1980 }
 0xba4   : > { %v1986_v45 = vsel %vm1058_vm4, %v1981_v43, 0 }
 0xba5   : > { %v1863_v26 = vpack.c.bf16 %v1862_v40, %v1862_v40 }
 0xba7   : > { %v2092_v39 = vpop.xlane.xlu0 %2091  ;;  %v2097_v47 = vpop.permute.xlu1 %2096 }
 0xba8   : > { %3113 = vrcp.f32 %v2092_v39  ;;  %v2102_v50 = vsel %vm1058_vm4, %v2097_v47, 0 }
 0xbaa   : > { %v3112_v44 = vpop.eup %3111 }
 0xbab   : > { %v1865_v41 = vpop.permute.xlu0 %1864  ;;  %v1978_v46 = vmul.f32 %v3112_v44, %v3104_v25 }
 0xbac   : > { %v1870_v42 = vsel %vm1058_vm4, %v1865_v41, 0  ;;  %v3079_v41 = vld [vmem:[%s4377_s12 + $0x10] sm:$0xff]  }
 0xbad   : > { %2863 = vmatpush3.bf16.msra.mxu1 %v1870_v42  ;;  %v1979_v48 = vpack.c.bf16 %v1978_v46, %v1978_v46  ;;  %v3080_v42 = vld [vmem:[%s4377_s12 + $0x18] sm:$0xff]  }
 0xbae   : > { %2874 = vmatprep.subr.bf16.mxu1 %v3468_v0 }
 0xbb0   : > { %2865 = vmatmul.mubr.msk.bf16.vlgmr.msra.gmra.mrb[32].mxu1 %vm992_vm2, %v1863_v26 }
 0xbb1   : > { %2875 = vmatpush3.bf16.msra.mxu1 %v1986_v45  ;;  %2876 = vmatprep.mubr.msk.bf16.mxu1 %vm3469_vm0, %v3468_v0 }
 0xbb2   : > { %2886 = vmatprep.subr.bf16.mxu1 %v3468_v0  ;;  %v3114_v49 = vpop.eup %3113 }
 0xbb3   : > { %v2094_v51 = vmul.f32 %v3114_v49, %v3106_v28  ;;  %v3075_v28 = vld [vmem:[%s4376_s9] sm:$0xff]  }
 0xbb5   : > { %v2095_v52 = vpack.c.bf16 %v2094_v51, %v2094_v51 }
 0xbb8   : > { %2877 = vmatmul.mubr.msk.bf16.vlgmr.msra.gmra.mrb[36].mxu1 %vm992_vm2, %v1979_v48 }
 0xbb9   : > { %2887 = vmatpush3.bf16.msra.mxu1 %v2102_v50  ;;  %2888 = vmatprep.mubr.msk.bf16.mxu1 %vm3469_vm0, %v3468_v0 }
 0xbba   : > { %2900 = vmatprep.subr.bf16.mxu1 %v3468_v0 }
 0xbc0   : > { %2889 = vmatmul.mubr.msk.bf16.vlgmr.msra.gmra.mrb[40].mxu1 %vm992_vm2, %v2095_v52 }
 0xbc1   : > { %2904 = vmatprep.mubr.msk.bf16.mxu1 %vm3469_vm0, %v3468_v0  ;;  %2901 = vmatpush3.bf16.msra.mxu1 %v3075_v28 }
 0xbc2   : > { %2902 = vmatprep.subr.bf16.mxu1 %v3468_v0 }
 0xbc5   : > { %2903 = vmatpush3.bf16.msra.mxu1 %v3076_v29 }
 0xc07   : > { %v1793_v53 = vpop.f32.mrb[28].mxu1 }
 0xc08   : > { %1799 = vst.msk [vmem:[#allocation2] sm:$0xff] %vm992_vm2, %v1793_v53  ;;  %v2854_v54 = vpop.f32.mrb[29].mxu1 }
 0xc09   : > { %v1796_v55 = vpop.f32.mrb[30].mxu1 }
 0xc0a   : > { %v2855_v56 = vpop.f32.mrb[31].mxu1 }
 0xc83   : > { %v1906_v57 = vpop.f32.mrb[32].mxu1 }
 0xc84   : > { %1913 = vrot.lane.b32.xlu0 %v1906_v57, %s4373_s25  ;;  %v2866_v58 = vpop.f32.mrb[33].mxu1  ;;  %s2706_s25 = sshll.u32 %s3631_s29, 7  ;;  %s3484_s29 = smov [#allocation18]  }
 0xc85   : > { %v1909_v59 = vpop.f32.mrb[34].mxu1  ;;  %s4221_s11 = scalar_lea.hbm %s4385_s10, %s2706_s25 }
 0xc86   : > { %v2867_v60 = vpop.f32.mrb[35].mxu1 }
 0xc8b   : > { %v2022_v63 = vpop.f32.mrb[36].mxu1 }
 0xc8c   : > { %2029 = vrot.lane.b32.xlu1 %v2022_v63, %s4374_s14  ;;  %v2878_v1 = vpop.f32.mrb[37].mxu1  ;;  %s4380_s14 = sld [smem:[#allocation39_spill]] }
 0xc8d   : > { %v2025_v2 = vpop.f32.mrb[38].mxu1 }
 0xc8e   : > { %v2879_v4 = vpop.f32.mrb[39].mxu1 }
 0xc8f   : > { %v2703_v4 = vld [vmem:[%s4382_s24] ss:$0 sm:$0xff]  ;;  %s3377_s24 = sshll.u32 %s3484_s29, 4  ;;  %s3378_s24 = int_to_ptr.vmem [resolvable:$false] %s3377_s24 }
 0xc90   : > { %s3379_s30 = scalar_lea.vmem %s3378_s24, 256 }
 0xc92   : > { %v2693_v43 = vld [vmem:[%s4380_s14] ss:$0 sm:$0xff]  ;;  %s4384_s14 = sshll.u32 %s3912_s8, 3 }
 0xc93   : > { %v2138_v5 = vpop.f32.mrb[40].mxu1 }
 0xc94   : > { %2145 = vrot.lane.b32.xlu0 %v2138_v5, %s4375_s6  ;;  %v2890_v6 = vpop.f32.mrb[41].mxu1  ;;  %s4378_s6 = sld [smem:[#allocation42_spill]] }
 0xc95   : > { %v2141_v3 = vpop.f32.mrb[42].mxu1  ;;  %v2704_v6 = vld [vmem:[%s4383_s16] ss:$0 sm:$0xff] }
 0xc96   : > { %v2891_v7 = vpop.f32.mrb[43].mxu1 }
 0xc9a   : > { %v2691_v35 = vld [vmem:[%s4378_s6] ss:$0 sm:$0xff]  ;;  %s899_s6 = scalar_lea.vmem [#allocation18], %s4384_s14 }
 0xc9b   : > { %s2444_s17 = sshll.u32 %s899_s6, 4  ;;  %s4223_s17 = int_to_ptr.vmem [resolvable:$true] %s2444_s17 }
 0xc9c   : > { %s3373_s0 = scalar_lea.vmem %s4223_s17, 128  ;;  %p3380_p3 = scmp.lt.s32.totalorder %s4223_s17, %s3378_s24 }
 0xc9d   : > { %p3374_p1 = scmp.ne.s32.totalorder %s4223_s17, %s3373_s0  ;;  %p3381_p4 = scmp.lt.s32.totalorder %s3379_s30, %s3373_s0 }
 0xc9f   : > { %p3375_p0 = pnand %p3374_p1, %p4386_p13  ;;  %p3382_p10 = por %p3381_p4, %p3380_p3 }
 0xca1   : > { %p3376_p2 = pneg %p3375_p0 }
 0xca3   : > { %p3383_p11 = pnand %p3382_p10, %p3376_p2 }
 0xcf6   : > { %v1914_v8 = vpop.permute.xlu0 %1913 }
 0xcf7   : > { %1916 = vst.msk [vmem:[#allocation2] sm:$0xff] %vm1219_vm5, %v1914_v8 }
 0xcfe   : > { %v2030_v9 = vpop.permute.xlu1 %2029 }
 0xcff   : > { %2032 = vst.msk [vmem:[#allocation2] sm:$0xff] %vm1336_vm6, %v2030_v9 }
 0xd06   : > { %v2146_v10 = vpop.permute.xlu0 %2145 }
 0xd07   : > { %2148 = vst.msk [vmem:[#allocation2] sm:$0xff] %vm1453_vm7, %v2146_v10 }
 0xd0e   : > { %v2149_v12 = vld [vmem:[#allocation2] sm:$0xff] }
 0xd0f   : > { %v2150_v13 = vpack.c.bf16 %v2149_v12, %v2149_v12 }
 0xd11   : > { %2897 = vmatmul.mubr.msk.bf16.vlgmr.msra.gmra.mrb[36].mxu0 %vm942_vm1, %v2150_v13 }
 0xd12   : > { %2916 = vmatprep.mubr.msk.bf16.mxu0 %vm3469_vm0, %v3468_v0 }
 0xde4   : > { %v2211_v15 = vpop.f32.mrb[36].mxu0 }
 0xde5   : > { %v2212_v16 = vadd.f32 %v2687_v14, %v2211_v15  ;;  %v2898_v17 = vpop.f32.mrb[37].mxu0 }
 0xde6   : > { %v2214_v18 = vpop.f32.mrb[38].mxu0 }
 0xde7   : > { %v2899_v19 = vpop.f32.mrb[39].mxu0  ;;  %v2217_v20 = vadd.f32 %v2212_v16, %v4077_v11  ;;  %v3077_v11 = vld [vmem:[%s4377_s12] sm:$0xff]  }
 0xde8   : > { %2909 = vmatpush3.bf16.msra.mxu0 %v3077_v11 }
 0xde9   : > { %v2220_v21 = vsel %vm942_vm1, %v2217_v20, 0.0  ;;  %2910 = vmatprep.subr.bf16.mxu0 %v3468_v0 }
 0xdea   : > { %2221 = vadd.xlane.f32.xlu1 %v2220_v21 }
 0xdec   : > { %2911 = vmatpush3.bf16.msra.mxu0 %v3078_v30 }
 0xded   : > { %2912 = vmatprep.subr.bf16.mxu0 %v3468_v0 }
 0xdf0   : > { %2913 = vmatpush3.bf16.msra.mxu0 %v3079_v41 }
 0xdf1   : > { %2914 = vmatprep.subr.bf16.mxu0 %v3468_v0  ;;  %v2697_v0 = vld [vmem:[%s4381_s2] ss:$0 sm:$0xff] }
 0xdf4   : > { %2915 = vmatpush3.bf16.msra.mxu0 %v3080_v42 }
 0xe77   : > { %v2222_v22 = vpop.xlane.xlu1 %2221 }
 0xe78   : > { %v2223_v23 = vmul.f32 0.03125, %v2222_v22 }
 0xe7a   : > { %v2224_v24 = vsub.f32 %v2217_v20, %v2223_v23 }
 0xe7c   : > { %v2225_v25 = vmul.f32 %v2224_v24, %v2224_v24 }
 0xe7e   : > { %v2226_v27 = vsel %vm942_vm1, %v2225_v25, 0.0 }
 0xe7f   : > { %2227 = vadd.xlane.f32.xlu0 %v2226_v27 }
 0xf0c   : > { %v2228_v31 = vpop.xlane.xlu0 %2227 }
 0xf0d   : > { %v2229_v32 = vmul.f32 0.03125, %v2228_v31 }
 0xf0f   : > { %v2230_v33 = vadd.f32 1e-05, %v2229_v32 }
 0xf11   : > { %3115 = vrsqrt.f32 %v2230_v33 }
 0xf1b   : > { %v3116_v34 = vpop.eup %3115 }
 0xf1c   : > { %v2232_v36 = vmul.f32 %v3116_v34, %v2224_v24 }
 0xf1e   : > { %v2239_v38 = vmul.f32 %v2691_v35, %v2232_v36 }
 0xf20   : > { %v2246_v39 = vadd.f32 %v2692_v37, %v2239_v38 }
 0xf22   : > { %v2247_v40 = vpack.c.bf16 %v2246_v39, %v2246_v39 }
 0xf24   : > { %2905 = vmatmul.mubr.msk.bf16.vlgmr.msra.gmra.mrb[44].mxu1 %vm942_vm1, %v2247_v40 }
 0xff7   : > { %v2308_v26 = vpop.f32.mrb[44].mxu1 }
 0xff8   : > { %v2309_v44 = vadd.f32 %v2693_v43, %v2308_v26  ;;  %v2906_v45 = vpop.f32.mrb[45].mxu1 }
 0xff9   : > { %v2311_v46 = vpop.f32.mrb[46].mxu1 }
 0xffa   : > { %v2314_v47 = vmax.f32 %v2309_v44, 0.0  ;;  %v2907_v48 = vpop.f32.mrb[47].mxu1 }
 0xffc   : > { %v2315_v49 = vpack.c.bf16 %v2314_v47, %v2314_v47 }
 0xffe   : > { %2917 = vmatmul.mubr.msk.bf16.vlgmr.msra.gmra.mrb[40].mxu0 %vm2355_vm9, %v2315_v49 }
0x10d1   : > { %v2393_v50 = vpop.f32.mrb[40].mxu0 }
0x10d2   : > { %v2394_v51 = vadd.f32 %v2697_v0, %v2393_v50  ;;  %v2918_v52 = vpop.f32.mrb[41].mxu0 }
0x10d3   : > { %v2396_v53 = vpop.f32.mrb[42].mxu0 }
0x10d4   : > { %v2919_v54 = vpop.f32.mrb[43].mxu0  ;;  %v2399_v55 = vadd.f32 %v2394_v51, %v2246_v39 }
0x10d6   : > { %v2402_v56 = vsel %vm942_vm1, %v2399_v55, 0.0 }
0x10d7   : > { %2403 = vadd.xlane.f32.xlu0 %v2402_v56 }
0x1164   : > { %v2404_v57 = vpop.xlane.xlu0 %2403 }
0x1165   : > { %v2405_v58 = vmul.f32 0.03125, %v2404_v57 }
0x1167   : > { %v2406_v59 = vsub.f32 %v2399_v55, %v2405_v58 }
0x1169   : > { %v2407_v60 = vmul.f32 %v2406_v59, %v2406_v59 }
0x116b   : > { %v2408_v61 = vsel %vm942_vm1, %v2407_v60, 0.0 }
0x116c   : > { %2409 = vadd.xlane.f32.xlu1 %v2408_v61 }
0x11f9   : > { %v2410_v62 = vpop.xlane.xlu1 %2409 }
0x11fa   : > { %v2411_v63 = vmul.f32 0.03125, %v2410_v62 }
0x11fc   : > { %v2412_v1 = vadd.f32 1e-05, %v2411_v63 }
0x11fe   : > { %3117 = vrsqrt.f32 %v2412_v1 }
0x1208   : > { %v3118_v2 = vpop.eup %3117 }
0x1209   : > { %v2414_v5 = vmul.f32 %v3118_v2, %v2406_v59 }
0x120b   : > { %v2421_v3 = vmul.f32 %v2703_v4, %v2414_v5 }
0x120d   : > { %v2428_v7 = vadd.f32 %v2704_v6, %v2421_v3 }
0x120f   : > { %2429 = vst.msk [vmem:[%s899_s6] sm:$0xff] %vm942_vm1, %v2428_v7 }
0x1210   : > { %3386 = shalt.err (!%p3383_p11)
}
0x1211   : > { %s3387_s8 = scalar_lea.hbm %s4221_s11, 128  ;;  %s3391_s16 = scalar_lea.hbm %s4385_s10, 256 }
0x1212   : > { %p3388_p8 = scmp.ne.s32.totalorder %s4221_s11, %s3387_s8  ;;  %p3392_p6 = scmp.lt.u32.totalorder %s4221_s11, %s4385_s10 }
0x1213   : > { %p3393_p9 = scmp.lt.u32.totalorder %s3391_s16, %s3387_s8  ;;  %p3395_p1 = scmp.lt.u32.totalorder %s3387_s8, %s4221_s11 }
0x1214   : > { %p3389_p5 = pnand %p3388_p8, %p4386_p13 }
0x1215   : > { %p3394_p12 = por %p3393_p9, %p3392_p6 }
0x1216   : > { %p3390_p7 = pneg %p3389_p5 }
0x1217   : > { %p3396_p0 = por %p3395_p1, %p3394_p12 }
0x1219   : > { %p3397_p2 = pnand %p3396_p0, %p3390_p7 }
0x121b   : > { %3400 = shalt.err (!%p3397_p2)
}
0x121c   : > { %2954 = dma.vmem_to_hbm [thread:$0]  (%p4386_p13), %s4223_s17, 128, %s4221_s11, %s2431_s20  }
0x121d PF: > { %s2456_s6 = sand.u32 1, %s3443_s5   ;;  %p4387_p3 = scmp.ne.s32.totalorder %s4352_s4, 0 }
0x121e   : > { %p4388_p4 = scmp.ge.s32.totalorder %s3455_s28, 2  ;;  %s2457_s2 = scalar_lea.sflag [#allocation5], %s2456_s6 }
0x1220   : > { %p2986_p10 = pnand %p4388_p4, %p4387_p3 }
0x1222   : > { %3438 = dma.done.wait (!%p2986_p10), %s2457_s2, 128  }
0x1223   : > { %3440 = vsyncadd (!%p2986_p10), %s2457_s2, 4294967168  ;;  %p41_p11 = scmp.ge.s32.totalorder %s3836_s3, 4   ;;  %s4389_s5 = smov %s3447_s26 }
0x1224   : > { %s4390_s26 = smov %s3451_s27  ;;  %s4391_s27 = smov %s3847_s1 }
0x1225   : > { %s4392_s28 = smov %s3836_s3  ;;  %43 = sbr.rel (!%p41_p11) target bundleno = 32 (0x20), region = 202 }
0x122c   :  { %2462 = vsyncpa [#allocation4], 1 }
0x122d   :  { %2464 = vsyncpa [#allocation4 + $0x1], 1 }
0x122e   :  { %2465 = vsyncpa [#allocation7], 1 }
0x122f   :  { %2466 = vsyncpa [#allocation10], 1 }
0x1230   :  { %2467 = vsyncpa [#allocation13], 1 }
0x1231   :  { %2468 = vsyncpa [#allocation16], 1 }
0x1232   :  { %2469 = vsyncpa [#allocation5], 1 }
0x1233   :  { %2471 = vsyncpa [#allocation5 + $0x1], 1 }

</bundles_post_ra>
